<compile_context>
chip_gen: v7x
topology: tpu7x:2x2x1
jax: 0.10.0
libtpu: 0.0.40
codegen_flags: <defaults>
</compile_context>

<pallas_src>
import functools

import jax
import jax.numpy as jnp
from jax.experimental import pallas as pl
from jax.experimental.pallas import tpu as pltpu


def _vlstm_kernel(x_ref, wx_ref, wh_ref, b_ref, wfc_ref, bfc_ref, out_ref, xw_ref, *,
                  seq_len, batch, hidden_size, fc_on_vpu):
    T, B, H = seq_len, batch, hidden_size

    # Hoisted input projection, staged to VMEM scratch (not a loop-spanning value).
    # x_ref: (T*B, D), wx_ref: (D, 4H), b_ref: (1, 4H) == bx + bh (pre-folded).
    xw_ref[...] = (jnp.dot(x_ref[...], wx_ref[...],
                           preferred_element_type=jnp.float32) + b_ref[...])

    h = jnp.zeros((B, H), jnp.float32)
    c = jnp.zeros((B, H), jnp.float32)

    # T is static -> fully unrolled recurrence; only h @ Wh is on the serial chain.
    for t in range(T):
        # Aligned (static multiple-of-8 start) slab load from scratch + per-step
        # read of Wh (bounded live range; no 64-vreg value spanning the loop).
        gates = xw_ref[pl.ds(t * B, B), :] + jnp.dot(
            h, wh_ref[...], preferred_element_type=jnp.float32)        # (B, 4H)

        # Gate order along 4H is [g | i | f | o] (columns permuted offline):
        # tanh on the first-popped (B, H) slab, sigmoid on one contiguous (B, 3H) slab.
        g_g = jnp.tanh(gates[:, :H])
        sig = jax.nn.sigmoid(gates[:, H:])
        i_g = sig[:, 0 * H:1 * H]
        f_g = sig[:, 1 * H:2 * H]
        o_g = sig[:, 2 * H:3 * H]

        c = f_g * c + i_g * g_g
        h = o_g * jnp.tanh(c)

    # Final fc on the last hidden state.
    if fc_on_vpu:
        # O == 1: wfc_ref is a (1, H) lane vector; VPU mul + XLU lane reduction
        # instead of an MXU fill/drain for a single output column.
        y = jnp.sum(h * wfc_ref[...], axis=-1, keepdims=True) + bfc_ref[...]
    else:
        y = jnp.dot(h, wfc_ref[...], preferred_element_type=jnp.float32) + bfc_ref[...]
    out_ref[...] = y.astype(out_ref.dtype)


def _permute_gate_cols(w):
    """Reorder gate columns from PyTorch [i|f|g|o] to kernel [g|i|f|o] (last axis)."""
    i, f, g, o = jnp.split(w, 4, axis=-1)
    return jnp.concatenate([g, i, f, o], axis=-1)


def prepare_kernel_params(params):
    """One-time re-layout of PyTorch-order params into kernel layout.

    Call once at setup (NOT per forward call): permutes gate columns
    [i|f|g|o] -> [g|i|f|o], folds the two biases, and (for output_size == 1)
    transposes the fc weight into a (1, H) lane vector for the VPU fc path.
    """
    wx, bx, wh, bh, wfc, bfc = params
    wx_p = _permute_gate_cols(wx)
    wh_p = _permute_gate_cols(wh)
    b_p = _permute_gate_cols(bx + bh)
    if wfc.shape[1] == 1:
        wfc_k = wfc.reshape(1, -1)          # (1, H) lane vector
    else:
        wfc_k = wfc                          # (H, O) MXU operand
    return (wx_p, wh_p, b_p, wfc_k, bfc)


def lstm_forward(x_btd, kparams):
    """x_btd: (B, T, input_size) float32. kparams: output of prepare_kernel_params."""
    wx_p, wh_p, b_p, wfc_k, bfc = kparams
    B, T, D = x_btd.shape
    H = wh_p.shape[0]
    O = bfc.shape[-1]
    fc_on_vpu = (O == 1 and wfc_k.shape[0] == 1)

    # Pad batch to a full sublane group (multiple of 8) for dense vregs / MXU rows.
    Bp = max(8, ((B + 7) // 8) * 8)
    if Bp != B:
        x_btd = jnp.pad(x_btd, ((0, Bp - B), (0, 0), (0, 0)))

    # Time-major, flattened to a single (T*Bp, D) matmul operand (layout only; the
    # (T, Bp, D) -> (T*Bp, D) reshape is contiguous after the transpose).
    x2d = jnp.transpose(x_btd, (1, 0, 2)).reshape(T * Bp, D)

    kernel = functools.partial(_vlstm_kernel, seq_len=T, batch=Bp, hidden_size=H,
                               fc_on_vpu=fc_on_vpu)

    flops = 2 * T * Bp * D * 4 * H + 2 * T * Bp * H * 4 * H + 2 * Bp * H * O
    transcendentals = T * Bp * 5 * H          # 3 sigmoid + 2 tanh slabs per step
    bytes_accessed = 4 * (x2d.size + wx_p.size + wh_p.size + b_p.size
                          + wfc_k.size + bfc.size + Bp * O)

    out = pl.pallas_call(
        kernel,
        out_shape=jax.ShapeDtypeStruct((Bp, O), jnp.float32),
        in_specs=[pl.BlockSpec(memory_space=pltpu.MemorySpace.VMEM)] * 6,
        out_specs=pl.BlockSpec(memory_space=pltpu.MemorySpace.VMEM),
        scratch_shapes=[pltpu.VMEM((T * Bp, 4 * H), jnp.float32)],
        cost_estimate=pl.CostEstimate(
            flops=flops,
            transcendentals=transcendentals,
            bytes_accessed=bytes_accessed),
    )(x2d, wx_p, wh_p, b_p, wfc_k, bfc)

    return out[:B]


def lstm_reference(x_btd, params):
    """Pure-JAX reference mirroring the PyTorch forward semantics (gate order [i|f|g|o])."""
    wx, bx, wh, bh, wfc, bfc = params
    B, T, _ = x_btd.shape
    H = wh.shape[0]
    h = jnp.zeros((B, H), jnp.float32)
    c = jnp.zeros((B, H), jnp.float32)
    for t in range(T):
        gates = x_btd[:, t, :] @ wx + bx + h @ wh + bh
        i_g = jax.nn.sigmoid(gates[:, 0 * H:1 * H])
        f_g = jax.nn.sigmoid(gates[:, 1 * H:2 * H])
        g_g = jnp.tanh(gates[:, 2 * H:3 * H])
        o_g = jax.nn.sigmoid(gates[:, 3 * H:4 * H])
        c = f_g * c + i_g * g_g
        h = o_g * jnp.tanh(c)
    # out = fc(outs[-1].squeeze())  (squeeze is a no-op for B > 1)
    return h @ wfc + bfc


def init_params(key, input_size, hidden_size, output_size):
    """Deterministic init matching the PyTorch module's parameter shapes.

    nn.Linear weights are (out, in); stored transposed here for matmul convenience.
    Uniform(-1/sqrt(H), 1/sqrt(H)) like LSTMCell.reset_parameters().
    Gate order along 4H is the PyTorch [i | f | g | o]; prepare_kernel_params
    permutes columns for the kernel.
    """
    ks = jax.random.split(key, 6)
    std = 1.0 / jnp.sqrt(hidden_size)
    wx = jax.random.uniform(ks[0], (input_size, 4 * hidden_size), jnp.float32, -std, std)
    bx = jax.random.uniform(ks[1], (1, 4 * hidden_size), jnp.float32, -std, std)
    wh = jax.random.uniform(ks[2], (hidden_size, 4 * hidden_size), jnp.float32, -std, std)
    bh = jax.random.uniform(ks[3], (1, 4 * hidden_size), jnp.float32, -std, std)
    wfc = jax.random.uniform(ks[4], (hidden_size, output_size), jnp.float32, -std, std)
    bfc = jax.random.uniform(ks[5], (1, output_size), jnp.float32, -std, std)
    return (wx, bx, wh, bh, wfc, bfc)


if __name__ == "__main__":
    # num_layers=1 as in the module default; single LSTMCell + fc.
    INPUT_SIZE, HIDDEN_SIZE, OUTPUT_SIZE = 60, 128, 1
    BATCH, SEQ = 4, 8

    key = jax.random.PRNGKey(0)
    k_x, k_p = jax.random.split(key)
    x = jax.random.normal(k_x, (BATCH, SEQ, INPUT_SIZE), jnp.float32)
    params = init_params(k_p, INPUT_SIZE, HIDDEN_SIZE, OUTPUT_SIZE)

    # One-time parameter re-layout (outside the per-call hot path).
    kparams = jax.tree_util.tree_map(jax.block_until_ready, prepare_kernel_params(params))

    fwd = jax.jit(lstm_forward)
    out = jax.block_until_ready(fwd(x, kparams))
    ref = jax.block_until_ready(lstm_reference(x, params))

    assert out.shape == (BATCH, OUTPUT_SIZE), out.shape
    assert jnp.allclose(out, ref, atol=1e-4, rtol=1e-4), (out, ref)
    print("KERNEL_OK")
</pallas_src>

<mosaic_0001>
module attributes {stable_mosaic.version = 11 : i64} {
  func.func @_vlstm_kernel(%arg0: memref<64x60xf32, #tpu.memory_space<vmem>>, %arg1: memref<60x512xf32, #tpu.memory_space<vmem>>, %arg2: memref<128x512xf32, #tpu.memory_space<vmem>>, %arg3: memref<1x512xf32, #tpu.memory_space<vmem>>, %arg4: memref<1x128xf32, #tpu.memory_space<vmem>>, %arg5: memref<1x1xf32, #tpu.memory_space<vmem>>, %arg6: memref<8x1xf32, #tpu.memory_space<vmem>>, %arg7: memref<64x512xf32, #tpu.memory_space<vmem>>) attributes {dimension_semantics = [], scalar_prefetch = 0 : i64, scratch_operands = 1 : i64, tpu.core_type = #tpu.core_type<tc>} {
    %c0 = arith.constant 0 : index
    %c0_0 = arith.constant 0 : index
    %0 = vector.load %arg0[%c0, %c0_0] : memref<64x60xf32, #tpu.memory_space<vmem>>, vector<64x60xf32>
    %c0_1 = arith.constant 0 : index
    %c0_2 = arith.constant 0 : index
    %1 = vector.load %arg1[%c0_1, %c0_2] : memref<60x512xf32, #tpu.memory_space<vmem>>, vector<60x512xf32>
    %cst = arith.constant dense<0.000000e+00> : vector<64x512xf32>
    %2 = tpu.matmul %0, %1, %cst {dimension_numbers = #tpu.dot_dimension_numbers<[1], [0], [0], [1], [0, 0, 1, 1], [], []>} : vector<64x60xf32>, vector<60x512xf32>, vector<64x512xf32> -> vector<64x512xf32>
    %c0_3 = arith.constant 0 : index
    %c0_4 = arith.constant 0 : index
    %3 = vector.load %arg3[%c0_3, %c0_4] : memref<1x512xf32, #tpu.memory_space<vmem>>, vector<1x512xf32>
    %4 = vector.broadcast %3 : vector<1x512xf32> to vector<64x512xf32>
    %5 = arith.addf %2, %4 : vector<64x512xf32>
    %c0_5 = arith.constant 0 : index
    %c0_6 = arith.constant 0 : index
    %6 = vector.load %arg7[%c0_5, %c0_6] : memref<64x512xf32, #tpu.memory_space<vmem>>, vector<64x512xf32>
    tpu.vector_store %arg7[%c0_5, %c0_6], %5 {strides = array<i32>} : memref<64x512xf32, #tpu.memory_space<vmem>>, vector<64x512xf32>,
    %cst_7 = arith.constant 0.000000e+00 : f32
    %7 = vector.broadcast %cst_7 : f32 to vector<8x128xf32>
    %cst_8 = arith.constant 0.000000e+00 : f32
    %8 = vector.broadcast %cst_8 : f32 to vector<8x128xf32>
    %c0_9 = arith.constant 0 : index
    %c0_10 = arith.constant 0 : index
    %9 = vector.load %arg7[%c0_9, %c0_10] : memref<64x512xf32, #tpu.memory_space<vmem>>, vector<8x512xf32>
    %c0_11 = arith.constant 0 : index
    %c0_12 = arith.constant 0 : index
    %10 = vector.load %arg2[%c0_11, %c0_12] : memref<128x512xf32, #tpu.memory_space<vmem>>, vector<128x512xf32>
    %cst_13 = arith.constant dense<0.000000e+00> : vector<8x512xf32>
    %11 = tpu.matmul %7, %10, %cst_13 {dimension_numbers = #tpu.dot_dimension_numbers<[1], [0], [0], [1], [0, 0, 1, 1], [], []>} : vector<8x128xf32>, vector<128x512xf32>, vector<8x512xf32> -> vector<8x512xf32>
    %12 = arith.addf %9, %11 : vector<8x512xf32>
    %13 = vector.extract_strided_slice %12 {offsets = [0, 0], sizes = [8, 128], strides = [1, 1]} : vector<8x512xf32> to vector<8x128xf32>
    %14 = math.tanh %13 : vector<8x128xf32>
    %15 = vector.extract_strided_slice %12 {offsets = [0, 128], sizes = [8, 384], strides = [1, 1]} : vector<8x512xf32> to vector<8x384xf32>
    %16 = arith.negf %15 : vector<8x384xf32>
    %17 = math.exp %16 : vector<8x384xf32>
    %cst_14 = arith.constant 1.000000e+00 : f32
    %18 = vector.broadcast %cst_14 : f32 to vector<8x384xf32>
    %19 = arith.addf %18, %17 : vector<8x384xf32>
    %20 = arith.divf %18, %19 : vector<8x384xf32>
    %21 = vector.extract_strided_slice %20 {offsets = [0, 0], sizes = [8, 128], strides = [1, 1]} : vector<8x384xf32> to vector<8x128xf32>
    %22 = vector.extract_strided_slice %20 {offsets = [0, 128], sizes = [8, 128], strides = [1, 1]} : vector<8x384xf32> to vector<8x128xf32>
    %23 = vector.extract_strided_slice %20 {offsets = [0, 256], sizes = [8, 128], strides = [1, 1]} : vector<8x384xf32> to vector<8x128xf32>
    %24 = arith.mulf %22, %8 : vector<8x128xf32>
    %25 = arith.mulf %21, %14 : vector<8x128xf32>
    %26 = arith.addf %24, %25 : vector<8x128xf32>
    %27 = math.tanh %26 : vector<8x128xf32>
    %28 = arith.mulf %23, %27 : vector<8x128xf32>
    %c8 = arith.constant 8 : index
    %c0_15 = arith.constant 0 : index
    %29 = vector.load %arg7[%c8, %c0_15] : memref<64x512xf32, #tpu.memory_space<vmem>>, vector<8x512xf32>
    %c0_16 = arith.constant 0 : index
    %c0_17 = arith.constant 0 : index
    %30 = vector.load %arg2[%c0_16, %c0_17] : memref<128x512xf32, #tpu.memory_space<vmem>>, vector<128x512xf32>
    %cst_18 = arith.constant dense<0.000000e+00> : vector<8x512xf32>
    %31 = tpu.matmul %28, %30, %cst_18 {dimension_numbers = #tpu.dot_dimension_numbers<[1], [0], [0], [1], [0, 0, 1, 1], [], []>} : vector<8x128xf32>, vector<128x512xf32>, vector<8x512xf32> -> vector<8x512xf32>
    %32 = arith.addf %29, %31 : vector<8x512xf32>
    %33 = vector.extract_strided_slice %32 {offsets = [0, 0], sizes = [8, 128], strides = [1, 1]} : vector<8x512xf32> to vector<8x128xf32>
    %34 = math.tanh %33 : vector<8x128xf32>
    %35 = vector.extract_strided_slice %32 {offsets = [0, 128], sizes = [8, 384], strides = [1, 1]} : vector<8x512xf32> to vector<8x384xf32>
    %36 = arith.negf %35 : vector<8x384xf32>
    %37 = math.exp %36 : vector<8x384xf32>
    %cst_19 = arith.constant 1.000000e+00 : f32
    %38 = vector.broadcast %cst_19 : f32 to vector<8x384xf32>
    %39 = arith.addf %38, %37 : vector<8x384xf32>
    %40 = arith.divf %38, %39 : vector<8x384xf32>
    %41 = vector.extract_strided_slice %40 {offsets = [0, 0], sizes = [8, 128], strides = [1, 1]} : vector<8x384xf32> to vector<8x128xf32>
    %42 = vector.extract_strided_slice %40 {offsets = [0, 128], sizes = [8, 128], strides = [1, 1]} : vector<8x384xf32> to vector<8x128xf32>
    %43 = vector.extract_strided_slice %40 {offsets = [0, 256], sizes = [8, 128], strides = [1, 1]} : vector<8x384xf32> to vector<8x128xf32>
    %44 = arith.mulf %42, %26 : vector<8x128xf32>
    %45 = arith.mulf %41, %34 : vector<8x128xf32>
    %46 = arith.addf %44, %45 : vector<8x128xf32>
    %47 = math.tanh %46 : vector<8x128xf32>
    %48 = arith.mulf %43, %47 : vector<8x128xf32>
    %c16 = arith.constant 16 : index
    %c0_20 = arith.constant 0 : index
    %49 = vector.load %arg7[%c16, %c0_20] : memref<64x512xf32, #tpu.memory_space<vmem>>, vector<8x512xf32>
    %c0_21 = arith.constant 0 : index
    %c0_22 = arith.constant 0 : index
    %50 = vector.load %arg2[%c0_21, %c0_22] : memref<128x512xf32, #tpu.memory_space<vmem>>, vector<128x512xf32>
    %cst_23 = arith.constant dense<0.000000e+00> : vector<8x512xf32>
    %51 = tpu.matmul %48, %50, %cst_23 {dimension_numbers = #tpu.dot_dimension_numbers<[1], [0], [0], [1], [0, 0, 1, 1], [], []>} : vector<8x128xf32>, vector<128x512xf32>, vector<8x512xf32> -> vector<8x512xf32>
    %52 = arith.addf %49, %51 : vector<8x512xf32>
    %53 = vector.extract_strided_slice %52 {offsets = [0, 0], sizes = [8, 128], strides = [1, 1]} : vector<8x512xf32> to vector<8x128xf32>
    %54 = math.tanh %53 : vector<8x128xf32>
    %55 = vector.extract_strided_slice %52 {offsets = [0, 128], sizes = [8, 384], strides = [1, 1]} : vector<8x512xf32> to vector<8x384xf32>
    %56 = arith.negf %55 : vector<8x384xf32>
    %57 = math.exp %56 : vector<8x384xf32>
    %cst_24 = arith.constant 1.000000e+00 : f32
    %58 = vector.broadcast %cst_24 : f32 to vector<8x384xf32>
    %59 = arith.addf %58, %57 : vector<8x384xf32>
    %60 = arith.divf %58, %59 : vector<8x384xf32>
    %61 = vector.extract_strided_slice %60 {offsets = [0, 0], sizes = [8, 128], strides = [1, 1]} : vector<8x384xf32> to vector<8x128xf32>
    %62 = vector.extract_strided_slice %60 {offsets = [0, 128], sizes = [8, 128], strides = [1, 1]} : vector<8x384xf32> to vector<8x128xf32>
    %63 = vector.extract_strided_slice %60 {offsets = [0, 256], sizes = [8, 128], strides = [1, 1]} : vector<8x384xf32> to vector<8x128xf32>
    %64 = arith.mulf %62, %46 : vector<8x128xf32>
    %65 = arith.mulf %61, %54 : vector<8x128xf32>
    %66 = arith.addf %64, %65 : vector<8x128xf32>
    %67 = math.tanh %66 : vector<8x128xf32>
    %68 = arith.mulf %63, %67 : vector<8x128xf32>
    %c24 = arith.constant 24 : index
    %c0_25 = arith.constant 0 : index
    %69 = vector.load %arg7[%c24, %c0_25] : memref<64x512xf32, #tpu.memory_space<vmem>>, vector<8x512xf32>
    %c0_26 = arith.constant 0 : index
    %c0_27 = arith.constant 0 : index
    %70 = vector.load %arg2[%c0_26, %c0_27] : memref<128x512xf32, #tpu.memory_space<vmem>>, vector<128x512xf32>
    %cst_28 = arith.constant dense<0.000000e+00> : vector<8x512xf32>
    %71 = tpu.matmul %68, %70, %cst_28 {dimension_numbers = #tpu.dot_dimension_numbers<[1], [0], [0], [1], [0, 0, 1, 1], [], []>} : vector<8x128xf32>, vector<128x512xf32>, vector<8x512xf32> -> vector<8x512xf32>
    %72 = arith.addf %69, %71 : vector<8x512xf32>
    %73 = vector.extract_strided_slice %72 {offsets = [0, 0], sizes = [8, 128], strides = [1, 1]} : vector<8x512xf32> to vector<8x128xf32>
    %74 = math.tanh %73 : vector<8x128xf32>
    %75 = vector.extract_strided_slice %72 {offsets = [0, 128], sizes = [8, 384], strides = [1, 1]} : vector<8x512xf32> to vector<8x384xf32>
    %76 = arith.negf %75 : vector<8x384xf32>
    %77 = math.exp %76 : vector<8x384xf32>
    %cst_29 = arith.constant 1.000000e+00 : f32
    %78 = vector.broadcast %cst_29 : f32 to vector<8x384xf32>
    %79 = arith.addf %78, %77 : vector<8x384xf32>
    %80 = arith.divf %78, %79 : vector<8x384xf32>
    %81 = vector.extract_strided_slice %80 {offsets = [0, 0], sizes = [8, 128], strides = [1, 1]} : vector<8x384xf32> to vector<8x128xf32>
    %82 = vector.extract_strided_slice %80 {offsets = [0, 128], sizes = [8, 128], strides = [1, 1]} : vector<8x384xf32> to vector<8x128xf32>
    %83 = vector.extract_strided_slice %80 {offsets = [0, 256], sizes = [8, 128], strides = [1, 1]} : vector<8x384xf32> to vector<8x128xf32>
    %84 = arith.mulf %82, %66 : vector<8x128xf32>
    %85 = arith.mulf %81, %74 : vector<8x128xf32>
    %86 = arith.addf %84, %85 : vector<8x128xf32>
    %87 = math.tanh %86 : vector<8x128xf32>
    %88 = arith.mulf %83, %87 : vector<8x128xf32>
    %c32 = arith.constant 32 : index
    %c0_30 = arith.constant 0 : index
    %89 = vector.load %arg7[%c32, %c0_30] : memref<64x512xf32, #tpu.memory_space<vmem>>, vector<8x512xf32>
    %c0_31 = arith.constant 0 : index
    %c0_32 = arith.constant 0 : index
    %90 = vector.load %arg2[%c0_31, %c0_32] : memref<128x512xf32, #tpu.memory_space<vmem>>, vector<128x512xf32>
    %cst_33 = arith.constant dense<0.000000e+00> : vector<8x512xf32>
    %91 = tpu.matmul %88, %90, %cst_33 {dimension_numbers = #tpu.dot_dimension_numbers<[1], [0], [0], [1], [0, 0, 1, 1], [], []>} : vector<8x128xf32>, vector<128x512xf32>, vector<8x512xf32> -> vector<8x512xf32>
    %92 = arith.addf %89, %91 : vector<8x512xf32>
    %93 = vector.extract_strided_slice %92 {offsets = [0, 0], sizes = [8, 128], strides = [1, 1]} : vector<8x512xf32> to vector<8x128xf32>
    %94 = math.tanh %93 : vector<8x128xf32>
    %95 = vector.extract_strided_slice %92 {offsets = [0, 128], sizes = [8, 384], strides = [1, 1]} : vector<8x512xf32> to vector<8x384xf32>
    %96 = arith.negf %95 : vector<8x384xf32>
    %97 = math.exp %96 : vector<8x384xf32>
    %cst_34 = arith.constant 1.000000e+00 : f32
    %98 = vector.broadcast %cst_34 : f32 to vector<8x384xf32>
    %99 = arith.addf %98, %97 : vector<8x384xf32>
    %100 = arith.divf %98, %99 : vector<8x384xf32>
    %101 = vector.extract_strided_slice %100 {offsets = [0, 0], sizes = [8, 128], strides = [1, 1]} : vector<8x384xf32> to vector<8x128xf32>
    %102 = vector.extract_strided_slice %100 {offsets = [0, 128], sizes = [8, 128], strides = [1, 1]} : vector<8x384xf32> to vector<8x128xf32>
    %103 = vector.extract_strided_slice %100 {offsets = [0, 256], sizes = [8, 128], strides = [1, 1]} : vector<8x384xf32> to vector<8x128xf32>
    %104 = arith.mulf %102, %86 : vector<8x128xf32>
    %105 = arith.mulf %101, %94 : vector<8x128xf32>
    %106 = arith.addf %104, %105 : vector<8x128xf32>
    %107 = math.tanh %106 : vector<8x128xf32>
    %108 = arith.mulf %103, %107 : vector<8x128xf32>
    %c40 = arith.constant 40 : index
    %c0_35 = arith.constant 0 : index
    %109 = vector.load %arg7[%c40, %c0_35] : memref<64x512xf32, #tpu.memory_space<vmem>>, vector<8x512xf32>
    %c0_36 = arith.constant 0 : index
    %c0_37 = arith.constant 0 : index
    %110 = vector.load %arg2[%c0_36, %c0_37] : memref<128x512xf32, #tpu.memory_space<vmem>>, vector<128x512xf32>
    %cst_38 = arith.constant dense<0.000000e+00> : vector<8x512xf32>
    %111 = tpu.matmul %108, %110, %cst_38 {dimension_numbers = #tpu.dot_dimension_numbers<[1], [0], [0], [1], [0, 0, 1, 1], [], []>} : vector<8x128xf32>, vector<128x512xf32>, vector<8x512xf32> -> vector<8x512xf32>
    %112 = arith.addf %109, %111 : vector<8x512xf32>
    %113 = vector.extract_strided_slice %112 {offsets = [0, 0], sizes = [8, 128], strides = [1, 1]} : vector<8x512xf32> to vector<8x128xf32>
    %114 = math.tanh %113 : vector<8x128xf32>
    %115 = vector.extract_strided_slice %112 {offsets = [0, 128], sizes = [8, 384], strides = [1, 1]} : vector<8x512xf32> to vector<8x384xf32>
    %116 = arith.negf %115 : vector<8x384xf32>
    %117 = math.exp %116 : vector<8x384xf32>
    %cst_39 = arith.constant 1.000000e+00 : f32
    %118 = vector.broadcast %cst_39 : f32 to vector<8x384xf32>
    %119 = arith.addf %118, %117 : vector<8x384xf32>
    %120 = arith.divf %118, %119 : vector<8x384xf32>
    %121 = vector.extract_strided_slice %120 {offsets = [0, 0], sizes = [8, 128], strides = [1, 1]} : vector<8x384xf32> to vector<8x128xf32>
    %122 = vector.extract_strided_slice %120 {offsets = [0, 128], sizes = [8, 128], strides = [1, 1]} : vector<8x384xf32> to vector<8x128xf32>
    %123 = vector.extract_strided_slice %120 {offsets = [0, 256], sizes = [8, 128], strides = [1, 1]} : vector<8x384xf32> to vector<8x128xf32>
    %124 = arith.mulf %122, %106 : vector<8x128xf32>
    %125 = arith.mulf %121, %114 : vector<8x128xf32>
    %126 = arith.addf %124, %125 : vector<8x128xf32>
    %127 = math.tanh %126 : vector<8x128xf32>
    %128 = arith.mulf %123, %127 : vector<8x128xf32>
    %c48 = arith.constant 48 : index
    %c0_40 = arith.constant 0 : index
    %129 = vector.load %arg7[%c48, %c0_40] : memref<64x512xf32, #tpu.memory_space<vmem>>, vector<8x512xf32>
    %c0_41 = arith.constant 0 : index
    %c0_42 = arith.constant 0 : index
    %130 = vector.load %arg2[%c0_41, %c0_42] : memref<128x512xf32, #tpu.memory_space<vmem>>, vector<128x512xf32>
    %cst_43 = arith.constant dense<0.000000e+00> : vector<8x512xf32>
    %131 = tpu.matmul %128, %130, %cst_43 {dimension_numbers = #tpu.dot_dimension_numbers<[1], [0], [0], [1], [0, 0, 1, 1], [], []>} : vector<8x128xf32>, vector<128x512xf32>, vector<8x512xf32> -> vector<8x512xf32>
    %132 = arith.addf %129, %131 : vector<8x512xf32>
    %133 = vector.extract_strided_slice %132 {offsets = [0, 0], sizes = [8, 128], strides = [1, 1]} : vector<8x512xf32> to vector<8x128xf32>
    %134 = math.tanh %133 : vector<8x128xf32>
    %135 = vector.extract_strided_slice %132 {offsets = [0, 128], sizes = [8, 384], strides = [1, 1]} : vector<8x512xf32> to vector<8x384xf32>
    %136 = arith.negf %135 : vector<8x384xf32>
    %137 = math.exp %136 : vector<8x384xf32>
    %cst_44 = arith.constant 1.000000e+00 : f32
    %138 = vector.broadcast %cst_44 : f32 to vector<8x384xf32>
    %139 = arith.addf %138, %137 : vector<8x384xf32>
    %140 = arith.divf %138, %139 : vector<8x384xf32>
    %141 = vector.extract_strided_slice %140 {offsets = [0, 0], sizes = [8, 128], strides = [1, 1]} : vector<8x384xf32> to vector<8x128xf32>
    %142 = vector.extract_strided_slice %140 {offsets = [0, 128], sizes = [8, 128], strides = [1, 1]} : vector<8x384xf32> to vector<8x128xf32>
    %143 = vector.extract_strided_slice %140 {offsets = [0, 256], sizes = [8, 128], strides = [1, 1]} : vector<8x384xf32> to vector<8x128xf32>
    %144 = arith.mulf %142, %126 : vector<8x128xf32>
    %145 = arith.mulf %141, %134 : vector<8x128xf32>
    %146 = arith.addf %144, %145 : vector<8x128xf32>
    %147 = math.tanh %146 : vector<8x128xf32>
    %148 = arith.mulf %143, %147 : vector<8x128xf32>
    %c56 = arith.constant 56 : index
    %c0_45 = arith.constant 0 : index
    %149 = vector.load %arg7[%c56, %c0_45] : memref<64x512xf32, #tpu.memory_space<vmem>>, vector<8x512xf32>
    %c0_46 = arith.constant 0 : index
    %c0_47 = arith.constant 0 : index
    %150 = vector.load %arg2[%c0_46, %c0_47] : memref<128x512xf32, #tpu.memory_space<vmem>>, vector<128x512xf32>
    %cst_48 = arith.constant dense<0.000000e+00> : vector<8x512xf32>
    %151 = tpu.matmul %148, %150, %cst_48 {dimension_numbers = #tpu.dot_dimension_numbers<[1], [0], [0], [1], [0, 0, 1, 1], [], []>} : vector<8x128xf32>, vector<128x512xf32>, vector<8x512xf32> -> vector<8x512xf32>
    %152 = arith.addf %149, %151 : vector<8x512xf32>
    %153 = vector.extract_strided_slice %152 {offsets = [0, 0], sizes = [8, 128], strides = [1, 1]} : vector<8x512xf32> to vector<8x128xf32>
    %154 = math.tanh %153 : vector<8x128xf32>
    %155 = vector.extract_strided_slice %152 {offsets = [0, 128], sizes = [8, 384], strides = [1, 1]} : vector<8x512xf32> to vector<8x384xf32>
    %156 = arith.negf %155 : vector<8x384xf32>
    %157 = math.exp %156 : vector<8x384xf32>
    %cst_49 = arith.constant 1.000000e+00 : f32
    %158 = vector.broadcast %cst_49 : f32 to vector<8x384xf32>
    %159 = arith.addf %158, %157 : vector<8x384xf32>
    %160 = arith.divf %158, %159 : vector<8x384xf32>
    %161 = vector.extract_strided_slice %160 {offsets = [0, 0], sizes = [8, 128], strides = [1, 1]} : vector<8x384xf32> to vector<8x128xf32>
    %162 = vector.extract_strided_slice %160 {offsets = [0, 128], sizes = [8, 128], strides = [1, 1]} : vector<8x384xf32> to vector<8x128xf32>
    %163 = vector.extract_strided_slice %160 {offsets = [0, 256], sizes = [8, 128], strides = [1, 1]} : vector<8x384xf32> to vector<8x128xf32>
    %164 = arith.mulf %162, %146 : vector<8x128xf32>
    %165 = arith.mulf %161, %154 : vector<8x128xf32>
    %166 = arith.addf %164, %165 : vector<8x128xf32>
    %167 = math.tanh %166 : vector<8x128xf32>
    %168 = arith.mulf %163, %167 : vector<8x128xf32>
    %c0_50 = arith.constant 0 : index
    %c0_51 = arith.constant 0 : index
    %169 = vector.load %arg4[%c0_50, %c0_51] : memref<1x128xf32, #tpu.memory_space<vmem>>, vector<1x128xf32>
    %170 = vector.broadcast %169 : vector<1x128xf32> to vector<8x128xf32>
    %171 = arith.mulf %168, %170 : vector<8x128xf32>
    %cst_52 = arith.constant dense<0.000000e+00> : vector<8xf32>
    %172 = vector.multi_reduction <add>, %171, %cst_52 [1] : vector<8x128xf32> to vector<8xf32>
    %173 = vector.shape_cast %172 : vector<8xf32> to vector<8x1xf32>
    %c0_53 = arith.constant 0 : index
    %c0_54 = arith.constant 0 : index
    %174 = vector.load %arg5[%c0_53, %c0_54] : memref<1x1xf32, #tpu.memory_space<vmem>>, vector<1x1xf32>
    %175 = vector.broadcast %174 : vector<1x1xf32> to vector<8x1xf32>
    %176 = arith.addf %173, %175 : vector<8x1xf32>
    %c0_55 = arith.constant 0 : index
    %c0_56 = arith.constant 0 : index
    %177 = vector.load %arg6[%c0_55, %c0_56] : memref<8x1xf32, #tpu.memory_space<vmem>>, vector<8x1xf32>
    tpu.vector_store %arg6[%c0_55, %c0_56], %176 {strides = array<i32>} : memref<8x1xf32, #tpu.memory_space<vmem>>, vector<8x1xf32>,
    return
  }
}

</mosaic_0001>

<bundles_post_ra>
// kernel: lstm_forward.1
= control target key start
LH: loop header
LB: loop body
LE: loop exit
PB: predicated region body
PF: predicated region fallthrough
CT: control target
= control target key end

     0   :  { %s3281_s0 = inlined_call_operand.vmem [shape: f32[64,60], index: 0, kind: input, shape index: {}]   ;;  %s3282_s1 = inlined_call_operand.hbm [shape: f32[60,512], index: 1, kind: input, shape index: {}]   ;;  %s3283_s2 = inlined_call_operand.hbm [shape: f32[128,512], index: 2, kind: input, shape index: {}]   ;;  %s3284_s3 = inlined_call_operand.vmem [shape: f32[1,512], index: 3, kind: input, shape index: {}]   ;;  %s3285_s4 = inlined_call_operand.vmem [shape: f32[1,128], index: 4, kind: input, shape index: {}]   ;;  %s3286_s5 = inlined_call_operand.<no memory space> [shape: f32[1,1], index: 5, kind: input, shape index: {}]   ;;  %s3287_s6 = inlined_call_operand.vmem [shape: f32[8,1], index: 6, kind: output, shape index: {}]  }
   0x1   :  { %v11_v0 = vstv %s3286_s5 }
   0x2   :  { %12 = vst [vmem:[#allocation3] sm:$0x1] %v11_v0 }
   0x3   :  { %13 = vsyncpa [#allocation5], 0 }
   0x4   :  { %14 = vsyncpa [#allocation7], 0  ;;  %s2733_s23 = smov [#allocation4]   ;;  %s2685_s27 = scalar_lea.hbm %s3282_s1, 4096 }
   0x5   :  { %s22_s24 = sshll.u32 %s2733_s23, 4  ;;  %p2686_p0 = scmp.ne.s32.totalorder %s3282_s1, %s2685_s27  ;;  %s23_s24 = int_to_ptr.vmem [resolvable:$true] %s22_s24 }
   0x6   :  { %p2689_p1 = scmp.lt.u32.totalorder %s2685_s27, %s3282_s1 }
   0x8   :  { %p2691_p2 = pnand %p2689_p1, %p2686_p0 }
   0xa   :  { %2694 = shalt.err (!%p2691_p2)
}
   0xb   :  { %s2695_s5 = scalar_lea.vmem %s23_s24, 4096  ;;  %p2700_p4 = scmp.lt.s32.totalorder %s23_s24, %s23_s24 }
   0xc   :  { %p2696_p3 = scmp.ne.s32.totalorder %s23_s24, %s2695_s5  ;;  %p2701_p5 = scmp.lt.s32.totalorder %s2695_s5, %s2695_s5 }
   0xe   :  { %p2702_p6 = por %p2701_p5, %p2700_p4 }
  0x10   :  { %p2703_p7 = pnand %p2702_p6, %p2696_p3 }
  0x12   :  { %2706 = shalt.err (!%p2703_p7)
}
  0x13   :  { %s2734_s8 = smov 512   ;;  %s2735_s9 = smov 32  }
  0x14   :  { %28 = dma.hbm_to_vmem [thread:$0]  %s3282_s1, 4096, %s23_s24, [#allocation5], %s2734_s8, %s2734_s8, %s2735_s9  }
  0x15   :  { %s2736_s12 = smov [#allocation6]   ;;  %s2707_s16 = scalar_lea.hbm %s3283_s2, 8192 }
  0x16   :  { %s34_s13 = sshll.u32 %s2736_s12, 4  ;;  %p2708_p8 = scmp.ne.s32.totalorder %s3283_s2, %s2707_s16  ;;  %s35_s13 = int_to_ptr.vmem [resolvable:$true] %s34_s13 }
  0x17   :  { %p2711_p9 = scmp.lt.u32.totalorder %s2707_s16, %s3283_s2 }
  0x19   :  { %p2713_p10 = pnand %p2711_p9, %p2708_p8 }
  0x1b   :  { %2716 = shalt.err (!%p2713_p10)
}
  0x1c   :  { %s2717_s21 = scalar_lea.vmem %s35_s13, 8192  ;;  %p2722_p12 = scmp.lt.s32.totalorder %s35_s13, %s35_s13 }
  0x1d   :  { %p2718_p11 = scmp.ne.s32.totalorder %s35_s13, %s2717_s21  ;;  %p2723_p13 = scmp.lt.s32.totalorder %s2717_s21, %s2717_s21 }
  0x1f   :  { %p2724_p0 = por %p2723_p13, %p2722_p12 }
  0x21   :  { %p2725_p1 = pnand %p2724_p0, %p2718_p11 }
  0x23   :  { %2728 = shalt.err (!%p2725_p1)
}
  0x24   :  { %40 = dma.hbm_to_vmem [thread:$0]  %s3283_s2, 8192, %s35_s13, [#allocation7], %s2734_s8, %s2734_s8, %s2735_s9  }
  0x25   :  { %2729 = dma.done.wait [#allocation5], 4096  }
  0x26   :  { %2730 = vsyncadd [#allocation5], 4294963200 }
  0x27   :  { %2731 = dma.done.wait [#allocation7], 8192  }
  0x28   :  { %2732 = vsyncadd [#allocation7], 4294959104  ;;  %v2737_v1 = vmov 0.0   ;;  %v62_v2 = vld [vmem:[#allocation4 + $0x8] sm:$0xff]  ;;  %v64_v4 = vld [vmem:[#allocation4 + $0x18] sm:$0xff]  ;;  %vm140_vm0 = vcmask 1043456  }
  0x29   :  { %217 = vmatprep.mubr.f32.mxu0 %v2737_v1  ;;  %330 = vmatprep.mubr.f32.mxu1 %v2737_v1  ;;  %v66_v3 = vld [vmem:[#allocation4 + $0x28] sm:$0xff]  ;;  %v68_v6 = vld [vmem:[#allocation4 + $0x38] sm:$0xff]  ;;  %v61_v7 = vld [vmem:[#allocation4] sm:$0xff]  ;;  %vm2738_vm1 = vmmov 1   ;;  %vm115_vm3 = vcmask 490496   ;;  %vm1885_vm4 = vcmask 7168  }
  0x2a   :  { %v1939_v5 = vpack.c.bf16 %v66_v3, %v62_v2  ;;  %v65_v8 = vld [vmem:[#allocation4 + $0x20] sm:$0xff]  ;;  %v1957_v9 = vpack.c.bf16 %v68_v6, %v64_v4  ;;  %v63_v11 = vld [vmem:[#allocation4 + $0x10] sm:$0xff]  ;;  %v70_v13 = vld [vmem:[#allocation4 + $0x48] sm:$0xff] }
  0x2b   :  { %v1941_v10 = vpack.c.bf16 %v65_v8, %v61_v7  ;;  %v67_v12 = vld [vmem:[#allocation4 + $0x30] sm:$0xff]  ;;  %v74_v15 = vld [vmem:[#allocation4 + $0x68] sm:$0xff]  ;;  %v72_v16 = vld [vmem:[#allocation4 + $0x58] sm:$0xff] }
  0x2c   :  { %1940 = vmatprep.subr.bf16.mxu0 %v1939_v5  ;;  %v1959_v14 = vpack.c.bf16 %v67_v12, %v63_v11  ;;  %v76_v17 = vld [vmem:[#allocation4 + $0x78] sm:$0xff]  ;;  %1958 = vmatprep.subr.bf16.mxu1 %v1957_v9  ;;  %v1943_v18 = vpack.c.bf16 %v74_v15, %v70_v13  ;;  %v69_v20 = vld [vmem:[#allocation4 + $0x40] sm:$0xff]  ;;  %v71_v22 = vld [vmem:[#allocation4 + $0x50] sm:$0xff] }
  0x2d   :  { %1942 = vmatpush1.bf16.msra.mxu0 %v1941_v10  ;;  %v1961_v19 = vpack.c.bf16 %v76_v17, %v72_v16  ;;  %v73_v21 = vld [vmem:[#allocation4 + $0x60] sm:$0xff]  ;;  %v75_v24 = vld [vmem:[#allocation4 + $0x70] sm:$0xff]  ;;  %v78_v25 = vld [vmem:[#allocation4 + $0x88] sm:$0xff] }
  0x2e   :  { %1960 = vmatpush1.bf16.msra.mxu1 %v1959_v14  ;;  %v1945_v23 = vpack.c.bf16 %v73_v21, %v69_v20  ;;  %v82_v26 = vld [vmem:[#allocation4 + $0xa8] sm:$0xff]  ;;  %1944 = vmatprep.subr.bf16.mxu0 %v1943_v18  ;;  %v1963_v27 = vpack.c.bf16 %v75_v24, %v71_v22  ;;  %v80_v29 = vld [vmem:[#allocation4 + $0x98] sm:$0xff]  ;;  %v77_v31 = vld [vmem:[#allocation4 + $0x80] sm:$0xff] }
  0x2f   :  { %1962 = vmatprep.subr.bf16.mxu1 %v1961_v19  ;;  %v1947_v28 = vpack.c.bf16 %v82_v26, %v78_v25  ;;  %v84_v30 = vld [vmem:[#allocation4 + $0xb8] sm:$0xff]  ;;  %v81_v33 = vld [vmem:[#allocation4 + $0xa0] sm:$0xff]  ;;  %v79_v34 = vld [vmem:[#allocation4 + $0x90] sm:$0xff] }
  0x30   :  { %v1965_v32 = vpack.c.bf16 %v84_v30, %v80_v29  ;;  %v83_v35 = vld [vmem:[#allocation4 + $0xb0] sm:$0xff]  ;;  %v1949_v36 = vpack.c.bf16 %v81_v33, %v77_v31  ;;  %v86_v37 = vld [vmem:[#allocation4 + $0xc8] sm:$0xff]  ;;  %v88_v39 = vld [vmem:[#allocation4 + $0xd8] sm:$0xff] }
  0x31   :  { %1946 = vmatpush1.bf16.msra.mxu0 %v1945_v23  ;;  %v90_v38 = vld [vmem:[#allocation4 + $0xe8] sm:$0xf]  ;;  %v1967_v40 = vpack.c.bf16 %v83_v35, %v79_v34  ;;  %v92_v42 = vld [vmem:[#allocation4 + $0xf8] sm:$0xf]  ;;  %v85_v43 = vld [vmem:[#allocation4 + $0xc0] sm:$0xff] }
  0x32   :  { %1964 = vmatpush1.bf16.msra.mxu1 %v1963_v27  ;;  %1948 = vmatprep.subr.bf16.mxu0 %v1947_v28  ;;  %v1951_v41 = vpack.c.bf16 %v90_v38, %v86_v37  ;;  %v89_v44 = vld [vmem:[#allocation4 + $0xe0] sm:$0xf]  ;;  %vm2804_vm2 = vmpackc.low %vm140_vm0, %vm2738_vm1  ;;  %v1969_v46 = vpack.c.bf16 %v92_v42, %v88_v39  ;;  %v87_v47 = vld [vmem:[#allocation4 + $0xd0] sm:$0xff] }
  0x33   :  { %1966 = vmatprep.subr.bf16.mxu1 %v1965_v32  ;;  %v91_v48 = vld [vmem:[#allocation4 + $0xf0] sm:$0xf]  ;;  %v416_v49 = vld [vmem:[#allocation6 + $0x8] sm:$0xff]  ;;  %v418_v51 = vld [vmem:[#allocation6 + $0x18] sm:$0xff]  ;;  %v1954_v52 = vpack.c.bf16 %v89_v44, %v85_v43 }
  0x34   :  { %v420_v50 = vld [vmem:[#allocation6 + $0x28] sm:$0xff]  ;;  %v422_v53 = vld [vmem:[#allocation6 + $0x38] sm:$0xff]  ;;  %v1972_v54 = vpack.c.bf16 %v91_v48, %v87_v47  ;;  %v415_v56 = vld [vmem:[#allocation6] sm:$0xff] }
  0x35   :  { %1950 = vmatpush1.bf16.msra.mxu0 %v1949_v36  ;;  %v2810_v55 = vpack.c.bf16 %v420_v50, %v416_v49  ;;  %v419_v57 = vld [vmem:[#allocation6 + $0x20] sm:$0xff]  ;;  %v2814_v58 = vpack.c.bf16 %v422_v53, %v418_v51  ;;  %v417_v59 = vld [vmem:[#allocation6 + $0x10] sm:$0xff]  ;;  %v424_v61 = vld [vmem:[#allocation6 + $0x48] sm:$0xff] }
  0x36   :  { %1968 = vmatpush1.bf16.msra.mxu1 %v1967_v40  ;;  %1953 = vmatprep.subr.msk.bf16.mxu0 %vm2804_vm2, %v1951_v41  ;;  %v421_v60 = vld [vmem:[#allocation6 + $0x30] sm:$0xff]  ;;  %v428_v62 = vld [vmem:[#allocation6 + $0x68] sm:$0xff]  ;;  %v53_v63 = vld [vmem:[%s3281_s0] sm:$0xff]  ;;  %v2821_v0 = vpack.c.bf16 %v419_v57, %v415_v56 }
  0x37   :  { %1971 = vmatprep.subr.msk.bf16.mxu1 %vm2804_vm2, %v1969_v46  ;;  %v426_v2 = vld [vmem:[#allocation6 + $0x58] sm:$0xff]  ;;  %v2826_v4 = vpack.c.bf16 %v421_v60, %v417_v59  ;;  %v423_v5 = vld [vmem:[#allocation6 + $0x40] sm:$0xff]  ;;  %v2829_v7 = vpack.c.bf16 %v428_v62, %v424_v61  ;;  %v425_v8 = vld [vmem:[#allocation6 + $0x50] sm:$0xff] }
  0x38   :  { %v430_v3 = vld [vmem:[#allocation6 + $0x78] sm:$0xff]  ;;  %v427_v6 = vld [vmem:[#allocation6 + $0x60] sm:$0xff]  ;;  %v429_v9 = vld [vmem:[#allocation6 + $0x70] sm:$0xff] }
  0x39   :  { %1956 = vmatpush1.bf16.msk.msra.mxu0 %vm2804_vm2, %v1954_v52  ;;  %v2832_v10 = vpack.c.bf16 %v430_v3, %v426_v2  ;;  %v432_v11 = vld [vmem:[#allocation6 + $0x88] sm:$0xff]  ;;  %v2839_v14 = vpack.c.bf16 %v427_v6, %v423_v5  ;;  %v434_v15 = vld [vmem:[#allocation6 + $0x98] sm:$0xff]  ;;  %v2843_v17 = vpack.c.bf16 %v429_v9, %v425_v8  ;;  %v431_v18 = vld [vmem:[#allocation6 + $0x80] sm:$0xff] }
  0x3a   :  { %1974 = vmatpush1.bf16.msk.msra.mxu1 %vm2804_vm2, %v1972_v54  ;;  %1976 = vmatprep.subr.bf16.mxu0 %v2810_v55  ;;  %v436_v12 = vld [vmem:[#allocation6 + $0xa8] sm:$0xff]  ;;  %v438_v16 = vld [vmem:[#allocation6 + $0xb8] sm:$0xff]  ;;  %v435_v19 = vld [vmem:[#allocation6 + $0xa0] sm:$0xff] }
  0x3b   :  { %2008 = vmatprep.subr.bf16.mxu1 %v2814_v58  ;;  %v54_v13 = vld [vmem:[%s3281_s0 + $0x8] sm:$0xff]  ;;  %v2847_v20 = vpack.c.bf16 %v436_v12, %v432_v11  ;;  %v433_v21 = vld [vmem:[#allocation6 + $0x90] sm:$0xff]  ;;  %v2851_v23 = vpack.c.bf16 %v438_v16, %v434_v15  ;;  %v2858_v27 = vpack.c.bf16 %v435_v19, %v431_v18  ;;  %v442_v28 = vld [vmem:[#allocation6 + $0xd8] sm:$0xff] }
  0x3c   :  { %1895 = vmatmul.mubr.msk.f32.vlgmr.msra.gmra.mrb[0].mxu0 %vm115_vm3, %v53_v63  ;;  %v437_v22 = vld [vmem:[#allocation6 + $0xb0] sm:$0xff]  ;;  %v440_v24 = vld [vmem:[#allocation6 + $0xc8] sm:$0xff]  ;;  %v446_v29 = vld [vmem:[#allocation6 + $0xf8] sm:$0xff] }
  0x3d   :  { %1905 = vmatmul.mubr.msk.f32.vlgmr.msra.gmra.mrb[0].mxu1 %vm115_vm3, %v53_v63  ;;  %1978 = vmatpush1.bf16.msra.mxu0 %v2821_v0  ;;  %v444_v25 = vld [vmem:[#allocation6 + $0xe8] sm:$0xff]  ;;  %v2862_v30 = vpack.c.bf16 %v437_v22, %v433_v21  ;;  %v439_v31 = vld [vmem:[#allocation6 + $0xc0] sm:$0xff]  ;;  %v441_v34 = vld [vmem:[#allocation6 + $0xd0] sm:$0xff]  ;;  %v2870_v36 = vpack.c.bf16 %v446_v29, %v442_v28 }
  0x3e   :  { %2010 = vmatpush1.bf16.msra.mxu1 %v2826_v4  ;;  %223 = vmatprep.mubr.f32.mxu0 %v2737_v1  ;;  %v55_v26 = vld [vmem:[%s3281_s0 + $0x10] sm:$0xff]  ;;  %v443_v32 = vld [vmem:[#allocation6 + $0xe0] sm:$0xff]  ;;  %v2866_v33 = vpack.c.bf16 %v444_v25, %v440_v24  ;;  %v56_v39 = vld [vmem:[%s3281_s0 + $0x18] sm:$0xff] }
  0x3f   :  { %336 = vmatprep.mubr.f32.mxu1 %v2737_v1  ;;  %1980 = vmatprep.subr.bf16.mxu0 %v2829_v7  ;;  %v445_v35 = vld [vmem:[#allocation6 + $0xf0] sm:$0xff]  ;;  %v448_v37 = vld [vmem:[#allocation6 + $0x108] sm:$0xff]  ;;  %v2877_v40 = vpack.c.bf16 %v443_v32, %v439_v31  ;;  %v450_v41 = vld [vmem:[#allocation6 + $0x118] sm:$0xff] }
  0x40   :  { %1896 = vmatmul.mubr.msk.f32.gmra.mrb[2].mxu0 %vm115_vm3, %v54_v13  ;;  %2012 = vmatprep.subr.bf16.mxu1 %v2832_v10  ;;  %v452_v38 = vld [vmem:[#allocation6 + $0x128] sm:$0xff]  ;;  %v454_v42 = vld [vmem:[#allocation6 + $0x138] sm:$0xff]  ;;  %v2881_v43 = vpack.c.bf16 %v445_v35, %v441_v34  ;;  %v447_v44 = vld [vmem:[#allocation6 + $0x100] sm:$0xff] }
  0x41   :  { %1906 = vmatmul.mubr.msk.f32.gmra.mrb[2].mxu1 %vm115_vm3, %v54_v13  ;;  %1982 = vmatpush1.bf16.msra.mxu0 %v2839_v14  ;;  %v451_v45 = vld [vmem:[#allocation6 + $0x120] sm:$0xff]  ;;  %v2885_v46 = vpack.c.bf16 %v452_v38, %v448_v37  ;;  %v449_v47 = vld [vmem:[#allocation6 + $0x110] sm:$0xff]  ;;  %v2889_v49 = vpack.c.bf16 %v454_v42, %v450_v41  ;;  %v456_v50 = vld [vmem:[#allocation6 + $0x148] sm:$0xff] }
  0x42   :  { %2014 = vmatpush1.bf16.msra.mxu1 %v2843_v17  ;;  %229 = vmatprep.mubr.f32.mxu0 %v2737_v1  ;;  %v453_v48 = vld [vmem:[#allocation6 + $0x130] sm:$0xff]  ;;  %v460_v51 = vld [vmem:[#allocation6 + $0x168] sm:$0xff]  ;;  %v57_v52 = vld [vmem:[%s3281_s0 + $0x20] sm:$0xff]  ;;  %v2896_v53 = vpack.c.bf16 %v451_v45, %v447_v44  ;;  %v95_v45 = vlaneseq }
  0x43   :  { %342 = vmatprep.mubr.f32.mxu1 %v2737_v1  ;;  %1984 = vmatprep.subr.bf16.mxu0 %v2847_v20  ;;  %v458_v54 = vld [vmem:[#allocation6 + $0x158] sm:$0xff]  ;;  %v2900_v57 = vpack.c.bf16 %v453_v48, %v449_v47  ;;  %v455_v59 = vld [vmem:[#allocation6 + $0x140] sm:$0xff]  ;;  %v2904_v61 = vpack.c.bf16 %v460_v51, %v456_v50  ;;  %v457_v62 = vld [vmem:[#allocation6 + $0x150] sm:$0xff] }
  0x44   :  { %1897 = vmatmul.mubr.msk.f32.gmra.mrb[4].mxu0 %vm115_vm3, %v55_v26  ;;  %2016 = vmatprep.subr.bf16.mxu1 %v2851_v23  ;;  %v462_v56 = vld [vmem:[#allocation6 + $0x178] sm:$0xff]  ;;  %v459_v60 = vld [vmem:[#allocation6 + $0x160] sm:$0xff]  ;;  %v461_v63 = vld [vmem:[#allocation6 + $0x170] sm:$0xff]  ;;  %v96_v47 = vshrl.u32 %v95_v45, 7 }
  0x45   :  { %1907 = vmatmul.mubr.msk.f32.gmra.mrb[4].mxu1 %vm115_vm3, %v55_v26  ;;  %1986 = vmatpush1.bf16.msra.mxu0 %v2858_v27  ;;  %v2908_v2 = vpack.c.bf16 %v462_v56, %v458_v54  ;;  %v464_v3 = vld [vmem:[#allocation6 + $0x188] sm:$0xff]  ;;  %v2915_v8 = vpack.c.bf16 %v459_v60, %v455_v59  ;;  %v466_v9 = vld [vmem:[#allocation6 + $0x198] sm:$0xff]  ;;  %v2919_v12 = vpack.c.bf16 %v461_v63, %v457_v62  ;;  %v463_v13 = vld [vmem:[#allocation6 + $0x180] sm:$0xff] }
  0x46   :  { %2018 = vmatpush1.bf16.msra.mxu1 %v2862_v30  ;;  %235 = vmatprep.mubr.f32.mxu0 %v2737_v1  ;;  %v468_v5 = vld [vmem:[#allocation6 + $0x1a8] sm:$0xff]  ;;  %v470_v11 = vld [vmem:[#allocation6 + $0x1b8] sm:$0xff]  ;;  %v467_v15 = vld [vmem:[#allocation6 + $0x1a0] sm:$0xff]  ;;  %v105_v48 = vsub.s32 2, %v96_v47  ;;  %v101_v50 = vsub.s32 1, %v96_v47  ;;  %v109_v62 = vsub.s32 3, %v96_v47 }
  0x47   :  { %348 = vmatprep.mubr.f32.mxu1 %v2737_v1  ;;  %1988 = vmatprep.subr.bf16.mxu0 %v2866_v33  ;;  %v58_v6 = vld [vmem:[%s3281_s0 + $0x28] sm:$0xff]  ;;  %v2923_v16 = vpack.c.bf16 %v468_v5, %v464_v3  ;;  %v465_v18 = vld [vmem:[#allocation6 + $0x190] sm:$0xff]  ;;  %v2927_v21 = vpack.c.bf16 %v470_v11, %v466_v9  ;;  %v2934_v26 = vpack.c.bf16 %v467_v15, %v463_v13  ;;  %v474_v28 = vld [vmem:[#allocation6 + $0x1d8] sm:$0xff]  ;;  %v97_v13 = vsub.s32 0, %v96_v47 }
  0x48   :  { %1898 = vmatmul.mubr.msk.f32.gmra.mrb[6].mxu0 %vm115_vm3, %v56_v39  ;;  %2020 = vmatprep.subr.bf16.mxu1 %v2870_v36  ;;  %v469_v19 = vld [vmem:[#allocation6 + $0x1b0] sm:$0xff]  ;;  %v472_v22 = vld [vmem:[#allocation6 + $0x1c8] sm:$0xff]  ;;  %v478_v29 = vld [vmem:[#allocation6 + $0x1f8] sm:$0xff] }
  0x49   :  { %1908 = vmatmul.mubr.msk.f32.gmra.mrb[6].mxu1 %vm115_vm3, %v56_v39  ;;  %1990 = vmatpush1.bf16.msra.mxu0 %v2877_v40  ;;  %v476_v24 = vld [vmem:[#allocation6 + $0x1e8] sm:$0xff]  ;;  %v2938_v31 = vpack.c.bf16 %v469_v19, %v465_v18  ;;  %v471_v32 = vld [vmem:[#allocation6 + $0x1c0] sm:$0xff]  ;;  %v473_v37 = vld [vmem:[#allocation6 + $0x1d0] sm:$0xff]  ;;  %v2946_v39 = vpack.c.bf16 %v478_v29, %v474_v28 }
  0x4a   :  { %2022 = vmatpush1.bf16.msra.mxu1 %v2881_v43  ;;  %241 = vmatprep.mubr.f32.mxu0 %v2737_v1  ;;  %v59_v25 = vld [vmem:[%s3281_s0 + $0x30] sm:$0xff]  ;;  %v475_v34 = vld [vmem:[#allocation6 + $0x1e0] sm:$0xff]  ;;  %v2942_v35 = vpack.c.bf16 %v476_v24, %v472_v22  ;;  %v60_v41 = vld [vmem:[%s3281_s0 + $0x38] sm:$0xff] }
  0x4b   :  { %354 = vmatprep.mubr.f32.mxu1 %v2737_v1  ;;  %1992 = vmatprep.subr.bf16.mxu0 %v2885_v46  ;;  %v477_v38 = vld [vmem:[#allocation6 + $0x1f0] sm:$0xff]  ;;  %v2953_v42 = vpack.c.bf16 %v475_v34, %v471_v32  ;;  %v93_v51 = vld [vmem:[%s3284_s3] sm:$0xf] }
  0x4c   :  { %1899 = vmatmul.mubr.msk.f32.gmra.mrb[8].mxu0 %vm115_vm3, %v57_v52  ;;  %2024 = vmatprep.subr.bf16.mxu1 %v2889_v49  ;;  %v2957_v44 = vpack.c.bf16 %v477_v38, %v473_v37  ;;  %v3011_v54 = vrot.slane %v93_v51, %v101_v50  ;;  %v3015_v11 = vrot.slane %v93_v51, %v109_v62 }
  0x4d   :  { %1909 = vmatmul.mubr.msk.f32.gmra.mrb[8].mxu1 %vm115_vm3, %v57_v52  ;;  %1994 = vmatpush1.bf16.msra.mxu0 %v2896_v53  ;;  %v3009_v52 = vrot.slane %v93_v51, %v105_v48  ;;  %v3018_v18 = vrot.slane %v93_v51, %v97_v13 }
  0x4e   :  { %2026 = vmatpush1.bf16.msra.mxu1 %v2900_v57  ;;  %247 = vmatprep.mubr.f32.mxu0 %v2737_v1 }
  0x4f   :  { %360 = vmatprep.mubr.f32.mxu1 %v2737_v1  ;;  %1996 = vmatprep.subr.bf16.mxu0 %v2904_v61 }
  0x50   :  { %1900 = vmatmul.mubr.msk.f32.gmra.mrb[10].mxu0 %vm115_vm3, %v58_v6  ;;  %2028 = vmatprep.subr.bf16.mxu1 %v2908_v2 }
  0x51   :  { %1910 = vmatmul.mubr.msk.f32.gmra.mrb[10].mxu1 %vm115_vm3, %v58_v6  ;;  %1998 = vmatpush1.bf16.msra.mxu0 %v2915_v8 }
  0x52   :  { %2030 = vmatpush1.bf16.msra.mxu1 %v2919_v12  ;;  %253 = vmatprep.mubr.f32.mxu0 %v2737_v1 }
  0x53   :  { %366 = vmatprep.mubr.f32.mxu1 %v2737_v1  ;;  %2000 = vmatprep.subr.bf16.mxu0 %v2923_v16 }
  0x54   :  { %1901 = vmatmul.mubr.msk.f32.gmra.mrb[12].mxu0 %vm115_vm3, %v59_v25  ;;  %2032 = vmatprep.subr.bf16.mxu1 %v2927_v21 }
  0x55   :  { %1911 = vmatmul.mubr.msk.f32.gmra.mrb[12].mxu1 %vm115_vm3, %v59_v25  ;;  %2002 = vmatpush1.bf16.msra.mxu0 %v2934_v26 }
  0x56   :  { %2034 = vmatpush1.bf16.msra.mxu1 %v2938_v31  ;;  %259 = vmatprep.mubr.f32.mxu0 %v2737_v1 }
  0x57   :  { %372 = vmatprep.mubr.f32.mxu1 %v2737_v1  ;;  %2004 = vmatprep.subr.bf16.mxu0 %v2942_v35 }
  0x58   :  { %1902 = vmatmul.mubr.msk.f32.gmra.mrb[14].mxu0 %vm115_vm3, %v60_v41  ;;  %2036 = vmatprep.subr.bf16.mxu1 %v2946_v39 }
  0x59   :  { %1912 = vmatmul.mubr.msk.f32.gmra.mrb[14].mxu1 %vm115_vm3, %v60_v41  ;;  %2006 = vmatpush1.bf16.msra.mxu0 %v2953_v42 }
  0x5a   :  { %2038 = vmatpush1.bf16.msra.mxu1 %v2957_v44  ;;  %543 = vmatprep.mubr.f32.mxu0 %v2737_v1 }
  0x5b   :  { %614 = vmatprep.mubr.f32.mxu1 %v2737_v1  ;;  %2040 = vmatprep.subr.bf16.mxu0 %v2810_v55 }
  0x5c   :  { %544 = vmatmul.mubr.f32.vlgmr.msra.gmra.mrb[0].mxu0 %v2737_v1  ;;  %2072 = vmatprep.subr.bf16.mxu1 %v2814_v58 }
  0x5d   :  { %615 = vmatmul.mubr.f32.vlgmr.msra.gmra.mrb[0].mxu1 %v2737_v1  ;;  %2042 = vmatpush1.bf16.msra.mxu0 %v2821_v0 }
  0x5e   :  { %2074 = vmatpush1.bf16.msra.mxu1 %v2826_v4  ;;  %2044 = vmatprep.subr.bf16.mxu0 %v2829_v7 }
  0x5f   :  { %2076 = vmatprep.subr.bf16.mxu1 %v2832_v10  ;;  %717 = vmatprep.mubr.f32.mxu0 %v2737_v1 }
  0x60   :  { %788 = vmatprep.mubr.f32.mxu1 %v2737_v1 }
  0x61   :  { %2046 = vmatpush1.bf16.msra.mxu0 %v2839_v14 }
  0x62   :  { %2078 = vmatpush1.bf16.msra.mxu1 %v2843_v17  ;;  %2048 = vmatprep.subr.bf16.mxu0 %v2847_v20 }
  0x63   :  { %2080 = vmatprep.subr.bf16.mxu1 %v2851_v23 }
  0x65   :  { %2050 = vmatpush1.bf16.msra.mxu0 %v2858_v27 }
  0x66   :  { %2082 = vmatpush1.bf16.msra.mxu1 %v2862_v30  ;;  %2052 = vmatprep.subr.bf16.mxu0 %v2866_v33 }
  0x67   :  { %2084 = vmatprep.subr.bf16.mxu1 %v2870_v36 }
  0x69   :  { %2054 = vmatpush1.bf16.msra.mxu0 %v2877_v40 }
  0x6a   :  { %2086 = vmatpush1.bf16.msra.mxu1 %v2881_v43  ;;  %2056 = vmatprep.subr.bf16.mxu0 %v2885_v46 }
  0x6b   :  { %2088 = vmatprep.subr.bf16.mxu1 %v2889_v49 }
  0x6d   :  { %2058 = vmatpush1.bf16.msra.mxu0 %v2896_v53 }
  0x6e   :  { %2090 = vmatpush1.bf16.msra.mxu1 %v2900_v57  ;;  %2060 = vmatprep.subr.bf16.mxu0 %v2904_v61 }
  0x6f   :  { %2092 = vmatprep.subr.bf16.mxu1 %v2908_v2 }
  0x71   :  { %2062 = vmatpush1.bf16.msra.mxu0 %v2915_v8 }
  0x72   :  { %2094 = vmatpush1.bf16.msra.mxu1 %v2919_v12  ;;  %2064 = vmatprep.subr.bf16.mxu0 %v2923_v16 }
  0x73   :  { %2096 = vmatprep.subr.bf16.mxu1 %v2927_v21 }
  0x75   :  { %2066 = vmatpush1.bf16.msra.mxu0 %v2934_v26 }
  0x76   :  { %2098 = vmatpush1.bf16.msra.mxu1 %v2938_v31  ;;  %2068 = vmatprep.subr.bf16.mxu0 %v2942_v35 }
  0x77   :  { %2100 = vmatprep.subr.bf16.mxu1 %v2946_v39 }
  0x79   :  { %2070 = vmatpush1.bf16.msra.mxu0 %v2953_v42 }
  0x7a   :  { %2102 = vmatpush1.bf16.msra.mxu1 %v2957_v44  ;;  %2104 = vmatprep.subr.bf16.mxu0 %v2810_v55 }
  0x7b   :  { %2136 = vmatprep.subr.bf16.mxu1 %v2814_v58 }
 0x12f   :  { %v545_v56 = vpop.f32.mrb[0].mxu0 }
 0x130   :  { %v616_v59 = vpop.f32.mrb[0].mxu1  ;;  %v547_v60 = vpop.f32.mrb[1].mxu0  ;;  %v2487_v22 = vadd.f32 %v545_v56, %v3018_v18 }
 0x131   :  { %v2503_v63 = vadd.f32 %v616_v59, %v3009_v52  ;;  %v2488_v3 = vadd.f32 %v547_v60, %v3011_v54  ;;  %v618_v5 = vpop.f32.mrb[1].mxu1 }
 0x132   :  { %v2504_v15 = vadd.f32 %v618_v5, %v3015_v11 }
 0x133   :  { %v1914_v6 = vmul.f32 -1.442695, %v2503_v63  ;;  %v1913_v9 = vmul.f32 -1.442695, %v2488_v3 }
 0x134   :  { %v1915_v19 = vmul.f32 -1.442695, %v2504_v15 }
 0x135   :  { %2557 = vpow2.f32 %v1914_v6 }
 0x136   :  { %2559 = vpow2.f32 %v1913_v9 }
 0x137   :  { %2561 = vpow2.f32 %v1915_v19 }
 0x138   :  { %2563 = vtanh.f32 %v2487_v22 }
 0x13f   :  { %v2558_v24 = vpop.eup %2557 }
 0x140   :  { %v2560_v25 = vpop.eup %2559  ;;  %v636_v28 = vadd.f32 1.0, %v2558_v24 }
 0x141   :  { %v635_v29 = vadd.f32 1.0, %v2560_v25  ;;  %v2562_v32 = vpop.eup %2561 }
 0x142   :  { %2565 = vrcp.f32 %v636_v28  ;;  %v2564_v34 = vpop.eup %2563  ;;  %v637_v45 = vadd.f32 1.0, %v2562_v32 }
 0x143   :  { %2567 = vrcp.f32 %v635_v29 }
 0x144   :  { %2569 = vrcp.f32 %v637_v45 }
 0x14c   :  { %v2566_v37 = vpop.eup %2565 }
 0x14d   :  { %v2568_v38 = vpop.eup %2567  ;;  %v644_v41 = vmul.f32 0.0, %v2566_v37 }
 0x14e   :  { %v645_v47 = vmul.f32 %v2568_v38, %v2564_v34  ;;  %v2570_v50 = vpop.eup %2569 }
 0x150   :  { %v3021_v48 = vadd.f32 %v645_v47, %v644_v41 }
 0x152   :  { %2571 = vtanh.f32 %v3021_v48 }
 0x15c   :  { %v2572_v51 = vpop.eup %2571 }
 0x15d   :  { %v648_v56 = vmul.f32 %v2572_v51, %v2570_v50 }
 0x15f   :  { %718 = vmatmul.mubr.f32.vlgmr.msra.gmra.mrb[2].mxu0 %v648_v56  ;;  %789 = vmatmul.mubr.f32.vlgmr.msra.gmra.mrb[2].mxu1 %v648_v56 }
 0x160   :  { %2106 = vmatpush1.bf16.msra.mxu0 %v2821_v0  ;;  %2138 = vmatpush1.bf16.msra.mxu1 %v2826_v4 }
 0x161   :  { %2108 = vmatprep.subr.bf16.mxu0 %v2829_v7  ;;  %2140 = vmatprep.subr.bf16.mxu1 %v2832_v10 }
 0x162   :  { %891 = vmatprep.mubr.f32.mxu0 %v2737_v1  ;;  %962 = vmatprep.mubr.f32.mxu1 %v2737_v1 }
 0x164   :  { %2110 = vmatpush1.bf16.msra.mxu0 %v2839_v14  ;;  %2142 = vmatpush1.bf16.msra.mxu1 %v2843_v17 }
 0x165   :  { %2112 = vmatprep.subr.bf16.mxu0 %v2847_v20  ;;  %2144 = vmatprep.subr.bf16.mxu1 %v2851_v23 }
 0x168   :  { %2114 = vmatpush1.bf16.msra.mxu0 %v2858_v27  ;;  %2146 = vmatpush1.bf16.msra.mxu1 %v2862_v30 }
 0x169   :  { %2116 = vmatprep.subr.bf16.mxu0 %v2866_v33  ;;  %2148 = vmatprep.subr.bf16.mxu1 %v2870_v36 }
 0x16c   :  { %2118 = vmatpush1.bf16.msra.mxu0 %v2877_v40  ;;  %2150 = vmatpush1.bf16.msra.mxu1 %v2881_v43 }
 0x16d   :  { %2120 = vmatprep.subr.bf16.mxu0 %v2885_v46  ;;  %2152 = vmatprep.subr.bf16.mxu1 %v2889_v49 }
 0x170   :  { %2122 = vmatpush1.bf16.msra.mxu0 %v2896_v53  ;;  %2154 = vmatpush1.bf16.msra.mxu1 %v2900_v57 }
 0x171   :  { %2124 = vmatprep.subr.bf16.mxu0 %v2904_v61  ;;  %2156 = vmatprep.subr.bf16.mxu1 %v2908_v2 }
 0x174   :  { %2126 = vmatpush1.bf16.msra.mxu0 %v2915_v8  ;;  %2158 = vmatpush1.bf16.msra.mxu1 %v2919_v12 }
 0x175   :  { %2128 = vmatprep.subr.bf16.mxu0 %v2923_v16  ;;  %2160 = vmatprep.subr.bf16.mxu1 %v2927_v21 }
 0x178   :  { %2130 = vmatpush1.bf16.msra.mxu0 %v2934_v26  ;;  %2162 = vmatpush1.bf16.msra.mxu1 %v2938_v31 }
 0x179   :  { %2132 = vmatprep.subr.bf16.mxu0 %v2942_v35  ;;  %2164 = vmatprep.subr.bf16.mxu1 %v2946_v39 }
 0x17c   :  { %2134 = vmatpush1.bf16.msra.mxu0 %v2953_v42  ;;  %2166 = vmatpush1.bf16.msra.mxu1 %v2957_v44 }
 0x17d   :  { %2168 = vmatprep.subr.bf16.mxu0 %v2810_v55  ;;  %2200 = vmatprep.subr.bf16.mxu1 %v2814_v58 }
 0x232   :  { %v719_v59 = vpop.f32.mrb[2].mxu0  ;;  %v790_v60 = vpop.f32.mrb[2].mxu1 }
 0x233   :  { %v2505_v62 = vadd.f32 %v790_v60, %v3009_v52  ;;  %v721_v63 = vpop.f32.mrb[3].mxu0  ;;  %v792_v3 = vpop.f32.mrb[3].mxu1  ;;  %v2489_v19 = vadd.f32 %v719_v59, %v3018_v18 }
 0x234   :  { %v2490_v5 = vadd.f32 %v721_v63, %v3011_v54  ;;  %v2506_v13 = vadd.f32 %v792_v3, %v3015_v11 }
 0x235   :  { %v1917_v6 = vmul.f32 -1.442695, %v2505_v62 }
 0x236   :  { %v1916_v9 = vmul.f32 -1.442695, %v2490_v5  ;;  %v1918_v15 = vmul.f32 -1.442695, %v2506_v13 }
 0x237   :  { %2573 = vpow2.f32 %v1917_v6 }
 0x238   :  { %2575 = vpow2.f32 %v1916_v9 }
 0x239   :  { %2577 = vpow2.f32 %v1918_v15 }
 0x23a   :  { %2579 = vtanh.f32 %v2489_v19 }
 0x241   :  { %v2574_v22 = vpop.eup %2573 }
 0x242   :  { %v2576_v24 = vpop.eup %2575  ;;  %v810_v25 = vadd.f32 1.0, %v2574_v22 }
 0x243   :  { %v809_v28 = vadd.f32 1.0, %v2576_v24  ;;  %v2578_v29 = vpop.eup %2577 }
 0x244   :  { %2581 = vrcp.f32 %v810_v25  ;;  %v2580_v32 = vpop.eup %2579  ;;  %v811_v41 = vadd.f32 1.0, %v2578_v29 }
 0x245   :  { %2583 = vrcp.f32 %v809_v28 }
 0x246   :  { %2585 = vrcp.f32 %v811_v41 }
 0x24e   :  { %v2582_v34 = vpop.eup %2581 }
 0x24f   :  { %v2584_v37 = vpop.eup %2583  ;;  %v818_v38 = vmul.f32 %v2582_v34, %v3021_v48 }
 0x250   :  { %v819_v45 = vmul.f32 %v2584_v37, %v2580_v32  ;;  %v2586_v50 = vpop.eup %2585 }
 0x252   :  { %v3063_v47 = vadd.f32 %v819_v45, %v818_v38 }
 0x254   :  { %2587 = vtanh.f32 %v3063_v47 }
 0x25e   :  { %v2588_v51 = vpop.eup %2587 }
 0x25f   :  { %v822_v56 = vmul.f32 %v2588_v51, %v2586_v50 }
 0x261   :  { %892 = vmatmul.mubr.f32.vlgmr.msra.gmra.mrb[4].mxu0 %v822_v56  ;;  %963 = vmatmul.mubr.f32.vlgmr.msra.gmra.mrb[4].mxu1 %v822_v56 }
 0x262   :  { %2170 = vmatpush1.bf16.msra.mxu0 %v2821_v0  ;;  %2202 = vmatpush1.bf16.msra.mxu1 %v2826_v4 }
 0x263   :  { %2172 = vmatprep.subr.bf16.mxu0 %v2829_v7  ;;  %2204 = vmatprep.subr.bf16.mxu1 %v2832_v10 }
 0x264   :  { %1065 = vmatprep.mubr.f32.mxu0 %v2737_v1  ;;  %1136 = vmatprep.mubr.f32.mxu1 %v2737_v1 }
 0x266   :  { %2174 = vmatpush1.bf16.msra.mxu0 %v2839_v14  ;;  %2206 = vmatpush1.bf16.msra.mxu1 %v2843_v17 }
 0x267   :  { %2176 = vmatprep.subr.bf16.mxu0 %v2847_v20  ;;  %2208 = vmatprep.subr.bf16.mxu1 %v2851_v23 }
 0x26a   :  { %2178 = vmatpush1.bf16.msra.mxu0 %v2858_v27  ;;  %2210 = vmatpush1.bf16.msra.mxu1 %v2862_v30 }
 0x26b   :  { %2180 = vmatprep.subr.bf16.mxu0 %v2866_v33  ;;  %2212 = vmatprep.subr.bf16.mxu1 %v2870_v36 }
 0x26e   :  { %2182 = vmatpush1.bf16.msra.mxu0 %v2877_v40  ;;  %2214 = vmatpush1.bf16.msra.mxu1 %v2881_v43 }
 0x26f   :  { %2184 = vmatprep.subr.bf16.mxu0 %v2885_v46  ;;  %2216 = vmatprep.subr.bf16.mxu1 %v2889_v49 }
 0x272   :  { %2186 = vmatpush1.bf16.msra.mxu0 %v2896_v53  ;;  %2218 = vmatpush1.bf16.msra.mxu1 %v2900_v57 }
 0x273   :  { %2188 = vmatprep.subr.bf16.mxu0 %v2904_v61  ;;  %2220 = vmatprep.subr.bf16.mxu1 %v2908_v2 }
 0x276   :  { %2190 = vmatpush1.bf16.msra.mxu0 %v2915_v8  ;;  %2222 = vmatpush1.bf16.msra.mxu1 %v2919_v12 }
 0x277   :  { %2192 = vmatprep.subr.bf16.mxu0 %v2923_v16  ;;  %2224 = vmatprep.subr.bf16.mxu1 %v2927_v21 }
 0x27a   :  { %2194 = vmatpush1.bf16.msra.mxu0 %v2934_v26  ;;  %2226 = vmatpush1.bf16.msra.mxu1 %v2938_v31 }
 0x27b   :  { %2196 = vmatprep.subr.bf16.mxu0 %v2942_v35  ;;  %2228 = vmatprep.subr.bf16.mxu1 %v2946_v39 }
 0x27e   :  { %2198 = vmatpush1.bf16.msra.mxu0 %v2953_v42  ;;  %2230 = vmatpush1.bf16.msra.mxu1 %v2957_v44 }
 0x27f   :  { %2232 = vmatprep.subr.bf16.mxu0 %v2810_v55  ;;  %2264 = vmatprep.subr.bf16.mxu1 %v2814_v58 }
 0x334   :  { %v893_v48 = vpop.f32.mrb[4].mxu0  ;;  %v964_v59 = vpop.f32.mrb[4].mxu1 }
 0x335   :  { %v2507_v60 = vadd.f32 %v964_v59, %v3009_v52  ;;  %v895_v62 = vpop.f32.mrb[5].mxu0  ;;  %v966_v63 = vpop.f32.mrb[5].mxu1  ;;  %v2491_v15 = vadd.f32 %v893_v48, %v3018_v18 }
 0x336   :  { %v2492_v3 = vadd.f32 %v895_v62, %v3011_v54  ;;  %v2508_v9 = vadd.f32 %v966_v63, %v3015_v11 }
 0x337   :  { %v1920_v5 = vmul.f32 -1.442695, %v2507_v60 }
 0x338   :  { %v1919_v6 = vmul.f32 -1.442695, %v2492_v3  ;;  %v1921_v13 = vmul.f32 -1.442695, %v2508_v9 }
 0x339   :  { %2589 = vpow2.f32 %v1920_v5 }
 0x33a   :  { %2591 = vpow2.f32 %v1919_v6 }
 0x33b   :  { %2593 = vpow2.f32 %v1921_v13 }
 0x33c   :  { %2595 = vtanh.f32 %v2491_v15 }
 0x343   :  { %v2590_v19 = vpop.eup %2589 }
 0x344   :  { %v2592_v22 = vpop.eup %2591  ;;  %v984_v24 = vadd.f32 1.0, %v2590_v19 }
 0x345   :  { %v983_v25 = vadd.f32 1.0, %v2592_v22  ;;  %v2594_v28 = vpop.eup %2593 }
 0x346   :  { %2597 = vrcp.f32 %v984_v24  ;;  %v2596_v29 = vpop.eup %2595  ;;  %v985_v38 = vadd.f32 1.0, %v2594_v28 }
 0x347   :  { %2599 = vrcp.f32 %v983_v25 }
 0x348   :  { %2601 = vrcp.f32 %v985_v38 }
 0x350   :  { %v2598_v32 = vpop.eup %2597 }
 0x351   :  { %v2600_v34 = vpop.eup %2599  ;;  %v992_v37 = vmul.f32 %v2598_v32, %v3063_v47 }
 0x352   :  { %v993_v41 = vmul.f32 %v2600_v34, %v2596_v29  ;;  %v2602_v50 = vpop.eup %2601 }
 0x354   :  { %v3105_v45 = vadd.f32 %v993_v41, %v992_v37 }
 0x356   :  { %2603 = vtanh.f32 %v3105_v45 }
 0x360   :  { %v2604_v51 = vpop.eup %2603 }
 0x361   :  { %v996_v56 = vmul.f32 %v2604_v51, %v2602_v50 }
 0x363   :  { %1066 = vmatmul.mubr.f32.vlgmr.msra.gmra.mrb[6].mxu0 %v996_v56  ;;  %1137 = vmatmul.mubr.f32.vlgmr.msra.gmra.mrb[6].mxu1 %v996_v56 }
 0x364   :  { %2234 = vmatpush1.bf16.msra.mxu0 %v2821_v0  ;;  %2266 = vmatpush1.bf16.msra.mxu1 %v2826_v4 }
 0x365   :  { %2236 = vmatprep.subr.bf16.mxu0 %v2829_v7  ;;  %2268 = vmatprep.subr.bf16.mxu1 %v2832_v10 }
 0x366   :  { %1239 = vmatprep.mubr.f32.mxu0 %v2737_v1  ;;  %1310 = vmatprep.mubr.f32.mxu1 %v2737_v1 }
 0x368   :  { %2238 = vmatpush1.bf16.msra.mxu0 %v2839_v14  ;;  %2270 = vmatpush1.bf16.msra.mxu1 %v2843_v17 }
 0x369   :  { %2240 = vmatprep.subr.bf16.mxu0 %v2847_v20  ;;  %2272 = vmatprep.subr.bf16.mxu1 %v2851_v23 }
 0x36c   :  { %2242 = vmatpush1.bf16.msra.mxu0 %v2858_v27  ;;  %2274 = vmatpush1.bf16.msra.mxu1 %v2862_v30 }
 0x36d   :  { %2244 = vmatprep.subr.bf16.mxu0 %v2866_v33  ;;  %2276 = vmatprep.subr.bf16.mxu1 %v2870_v36 }
 0x370   :  { %2246 = vmatpush1.bf16.msra.mxu0 %v2877_v40  ;;  %2278 = vmatpush1.bf16.msra.mxu1 %v2881_v43 }
 0x371   :  { %2248 = vmatprep.subr.bf16.mxu0 %v2885_v46  ;;  %2280 = vmatprep.subr.bf16.mxu1 %v2889_v49 }
 0x374   :  { %2250 = vmatpush1.bf16.msra.mxu0 %v2896_v53  ;;  %2282 = vmatpush1.bf16.msra.mxu1 %v2900_v57 }
 0x375   :  { %2252 = vmatprep.subr.bf16.mxu0 %v2904_v61  ;;  %2284 = vmatprep.subr.bf16.mxu1 %v2908_v2 }
 0x378   :  { %2254 = vmatpush1.bf16.msra.mxu0 %v2915_v8  ;;  %2286 = vmatpush1.bf16.msra.mxu1 %v2919_v12 }
 0x379   :  { %2256 = vmatprep.subr.bf16.mxu0 %v2923_v16  ;;  %2288 = vmatprep.subr.bf16.mxu1 %v2927_v21 }
 0x37c   :  { %2258 = vmatpush1.bf16.msra.mxu0 %v2934_v26  ;;  %2290 = vmatpush1.bf16.msra.mxu1 %v2938_v31 }
 0x37d   :  { %2260 = vmatprep.subr.bf16.mxu0 %v2942_v35  ;;  %2292 = vmatprep.subr.bf16.mxu1 %v2946_v39 }
 0x380   :  { %2262 = vmatpush1.bf16.msra.mxu0 %v2953_v42  ;;  %2294 = vmatpush1.bf16.msra.mxu1 %v2957_v44 }
 0x381   :  { %2296 = vmatprep.subr.bf16.mxu0 %v2810_v55  ;;  %2328 = vmatprep.subr.bf16.mxu1 %v2814_v58 }
 0x436   :  { %v1067_v47 = vpop.f32.mrb[6].mxu0  ;;  %v1138_v48 = vpop.f32.mrb[6].mxu1 }
 0x437   :  { %v2509_v59 = vadd.f32 %v1138_v48, %v3009_v52  ;;  %v1069_v60 = vpop.f32.mrb[7].mxu0  ;;  %v1140_v62 = vpop.f32.mrb[7].mxu1  ;;  %v2493_v13 = vadd.f32 %v1067_v47, %v3018_v18 }
 0x438   :  { %v2494_v63 = vadd.f32 %v1069_v60, %v3011_v54  ;;  %v2510_v6 = vadd.f32 %v1140_v62, %v3015_v11 }
 0x439   :  { %v1923_v3 = vmul.f32 -1.442695, %v2509_v59 }
 0x43a   :  { %v1922_v5 = vmul.f32 -1.442695, %v2494_v63  ;;  %v1924_v9 = vmul.f32 -1.442695, %v2510_v6 }
 0x43b   :  { %2605 = vpow2.f32 %v1923_v3 }
 0x43c   :  { %2607 = vpow2.f32 %v1922_v5 }
 0x43d   :  { %2609 = vpow2.f32 %v1924_v9 }
 0x43e   :  { %2611 = vtanh.f32 %v2493_v13 }
 0x445   :  { %v2606_v15 = vpop.eup %2605 }
 0x446   :  { %v2608_v19 = vpop.eup %2607  ;;  %v1158_v22 = vadd.f32 1.0, %v2606_v15 }
 0x447   :  { %v1157_v24 = vadd.f32 1.0, %v2608_v19  ;;  %v2610_v25 = vpop.eup %2609 }
 0x448   :  { %2613 = vrcp.f32 %v1158_v22  ;;  %v2612_v28 = vpop.eup %2611  ;;  %v1159_v37 = vadd.f32 1.0, %v2610_v25 }
 0x449   :  { %2615 = vrcp.f32 %v1157_v24 }
 0x44a   :  { %2617 = vrcp.f32 %v1159_v37 }
 0x452   :  { %v2614_v29 = vpop.eup %2613 }
 0x453   :  { %v2616_v32 = vpop.eup %2615  ;;  %v1166_v34 = vmul.f32 %v2614_v29, %v3105_v45 }
 0x454   :  { %v1167_v38 = vmul.f32 %v2616_v32, %v2612_v28  ;;  %v2618_v50 = vpop.eup %2617 }
 0x456   :  { %v3147_v41 = vadd.f32 %v1167_v38, %v1166_v34 }
 0x458   :  { %2619 = vtanh.f32 %v3147_v41 }
 0x462   :  { %v2620_v51 = vpop.eup %2619 }
 0x463   :  { %v1170_v56 = vmul.f32 %v2620_v51, %v2618_v50 }
 0x465   :  { %1240 = vmatmul.mubr.f32.vlgmr.msra.gmra.mrb[8].mxu0 %v1170_v56  ;;  %1311 = vmatmul.mubr.f32.vlgmr.msra.gmra.mrb[8].mxu1 %v1170_v56 }
 0x466   :  { %2298 = vmatpush1.bf16.msra.mxu0 %v2821_v0  ;;  %2330 = vmatpush1.bf16.msra.mxu1 %v2826_v4 }
 0x467   :  { %2300 = vmatprep.subr.bf16.mxu0 %v2829_v7  ;;  %2332 = vmatprep.subr.bf16.mxu1 %v2832_v10 }
 0x468   :  { %1413 = vmatprep.mubr.f32.mxu0 %v2737_v1  ;;  %1484 = vmatprep.mubr.f32.mxu1 %v2737_v1 }
 0x46a   :  { %2302 = vmatpush1.bf16.msra.mxu0 %v2839_v14  ;;  %2334 = vmatpush1.bf16.msra.mxu1 %v2843_v17 }
 0x46b   :  { %2304 = vmatprep.subr.bf16.mxu0 %v2847_v20  ;;  %2336 = vmatprep.subr.bf16.mxu1 %v2851_v23 }
 0x46e   :  { %2306 = vmatpush1.bf16.msra.mxu0 %v2858_v27  ;;  %2338 = vmatpush1.bf16.msra.mxu1 %v2862_v30 }
 0x46f   :  { %2308 = vmatprep.subr.bf16.mxu0 %v2866_v33  ;;  %2340 = vmatprep.subr.bf16.mxu1 %v2870_v36 }
 0x472   :  { %2310 = vmatpush1.bf16.msra.mxu0 %v2877_v40  ;;  %2342 = vmatpush1.bf16.msra.mxu1 %v2881_v43 }
 0x473   :  { %2312 = vmatprep.subr.bf16.mxu0 %v2885_v46  ;;  %2344 = vmatprep.subr.bf16.mxu1 %v2889_v49 }
 0x476   :  { %2314 = vmatpush1.bf16.msra.mxu0 %v2896_v53  ;;  %2346 = vmatpush1.bf16.msra.mxu1 %v2900_v57 }
 0x477   :  { %2316 = vmatprep.subr.bf16.mxu0 %v2904_v61  ;;  %2348 = vmatprep.subr.bf16.mxu1 %v2908_v2 }
 0x47a   :  { %2318 = vmatpush1.bf16.msra.mxu0 %v2915_v8  ;;  %2350 = vmatpush1.bf16.msra.mxu1 %v2919_v12 }
 0x47b   :  { %2320 = vmatprep.subr.bf16.mxu0 %v2923_v16  ;;  %2352 = vmatprep.subr.bf16.mxu1 %v2927_v21 }
 0x47e   :  { %2322 = vmatpush1.bf16.msra.mxu0 %v2934_v26  ;;  %2354 = vmatpush1.bf16.msra.mxu1 %v2938_v31 }
 0x47f   :  { %2324 = vmatprep.subr.bf16.mxu0 %v2942_v35  ;;  %2356 = vmatprep.subr.bf16.mxu1 %v2946_v39 }
 0x482   :  { %2326 = vmatpush1.bf16.msra.mxu0 %v2953_v42  ;;  %2358 = vmatpush1.bf16.msra.mxu1 %v2957_v44 }
 0x483   :  { %2360 = vmatprep.subr.bf16.mxu0 %v2810_v55  ;;  %2392 = vmatprep.subr.bf16.mxu1 %v2814_v58 }
 0x538   :  { %v1241_v45 = vpop.f32.mrb[8].mxu0  ;;  %v1312_v47 = vpop.f32.mrb[8].mxu1 }
 0x539   :  { %v2511_v48 = vadd.f32 %v1312_v47, %v3009_v52  ;;  %v1243_v59 = vpop.f32.mrb[9].mxu0  ;;  %v1314_v60 = vpop.f32.mrb[9].mxu1  ;;  %v2495_v9 = vadd.f32 %v1241_v45, %v3018_v18 }
 0x53a   :  { %v2496_v62 = vadd.f32 %v1243_v59, %v3011_v54  ;;  %v2512_v5 = vadd.f32 %v1314_v60, %v3015_v11 }
 0x53b   :  { %v1926_v63 = vmul.f32 -1.442695, %v2511_v48 }
 0x53c   :  { %v1925_v3 = vmul.f32 -1.442695, %v2496_v62  ;;  %v1927_v6 = vmul.f32 -1.442695, %v2512_v5 }
 0x53d   :  { %2621 = vpow2.f32 %v1926_v63 }
 0x53e   :  { %2623 = vpow2.f32 %v1925_v3 }
 0x53f   :  { %2625 = vpow2.f32 %v1927_v6 }
 0x540   :  { %2627 = vtanh.f32 %v2495_v9 }
 0x547   :  { %v2622_v13 = vpop.eup %2621 }
 0x548   :  { %v2624_v15 = vpop.eup %2623  ;;  %v1332_v19 = vadd.f32 1.0, %v2622_v13 }
 0x549   :  { %v1331_v22 = vadd.f32 1.0, %v2624_v15  ;;  %v2626_v24 = vpop.eup %2625 }
 0x54a   :  { %2629 = vrcp.f32 %v1332_v19  ;;  %v2628_v25 = vpop.eup %2627  ;;  %v1333_v34 = vadd.f32 1.0, %v2626_v24 }
 0x54b   :  { %2631 = vrcp.f32 %v1331_v22 }
 0x54c   :  { %2633 = vrcp.f32 %v1333_v34 }
 0x554   :  { %v2630_v28 = vpop.eup %2629 }
 0x555   :  { %v2632_v29 = vpop.eup %2631  ;;  %v1340_v32 = vmul.f32 %v2630_v28, %v3147_v41 }
 0x556   :  { %v1341_v37 = vmul.f32 %v2632_v29, %v2628_v25  ;;  %v2634_v50 = vpop.eup %2633 }
 0x558   :  { %v3189_v38 = vadd.f32 %v1341_v37, %v1340_v32 }
 0x55a   :  { %2635 = vtanh.f32 %v3189_v38 }
 0x564   :  { %v2636_v51 = vpop.eup %2635 }
 0x565   :  { %v1344_v56 = vmul.f32 %v2636_v51, %v2634_v50 }
 0x567   :  { %1414 = vmatmul.mubr.f32.vlgmr.msra.gmra.mrb[10].mxu0 %v1344_v56  ;;  %1485 = vmatmul.mubr.f32.vlgmr.msra.gmra.mrb[10].mxu1 %v1344_v56 }
 0x568   :  { %2362 = vmatpush1.bf16.msra.mxu0 %v2821_v0  ;;  %2394 = vmatpush1.bf16.msra.mxu1 %v2826_v4 }
 0x569   :  { %2364 = vmatprep.subr.bf16.mxu0 %v2829_v7  ;;  %2396 = vmatprep.subr.bf16.mxu1 %v2832_v10 }
 0x56a   :  { %1587 = vmatprep.mubr.f32.mxu0 %v2737_v1  ;;  %1658 = vmatprep.mubr.f32.mxu1 %v2737_v1 }
 0x56c   :  { %2366 = vmatpush1.bf16.msra.mxu0 %v2839_v14  ;;  %2398 = vmatpush1.bf16.msra.mxu1 %v2843_v17 }
 0x56d   :  { %2368 = vmatprep.subr.bf16.mxu0 %v2847_v20  ;;  %2400 = vmatprep.subr.bf16.mxu1 %v2851_v23 }
 0x570   :  { %2370 = vmatpush1.bf16.msra.mxu0 %v2858_v27  ;;  %2402 = vmatpush1.bf16.msra.mxu1 %v2862_v30 }
 0x571   :  { %2372 = vmatprep.subr.bf16.mxu0 %v2866_v33  ;;  %2404 = vmatprep.subr.bf16.mxu1 %v2870_v36 }
 0x574   :  { %2374 = vmatpush1.bf16.msra.mxu0 %v2877_v40  ;;  %2406 = vmatpush1.bf16.msra.mxu1 %v2881_v43 }
 0x575   :  { %2376 = vmatprep.subr.bf16.mxu0 %v2885_v46  ;;  %2408 = vmatprep.subr.bf16.mxu1 %v2889_v49 }
 0x578   :  { %2378 = vmatpush1.bf16.msra.mxu0 %v2896_v53  ;;  %2410 = vmatpush1.bf16.msra.mxu1 %v2900_v57 }
 0x579   :  { %2380 = vmatprep.subr.bf16.mxu0 %v2904_v61  ;;  %2412 = vmatprep.subr.bf16.mxu1 %v2908_v2 }
 0x57c   :  { %2382 = vmatpush1.bf16.msra.mxu0 %v2915_v8  ;;  %2414 = vmatpush1.bf16.msra.mxu1 %v2919_v12 }
 0x57d   :  { %2384 = vmatprep.subr.bf16.mxu0 %v2923_v16  ;;  %2416 = vmatprep.subr.bf16.mxu1 %v2927_v21 }
 0x580   :  { %2386 = vmatpush1.bf16.msra.mxu0 %v2934_v26  ;;  %2418 = vmatpush1.bf16.msra.mxu1 %v2938_v31 }
 0x581   :  { %2388 = vmatprep.subr.bf16.mxu0 %v2942_v35  ;;  %2420 = vmatprep.subr.bf16.mxu1 %v2946_v39 }
 0x584   :  { %2390 = vmatpush1.bf16.msra.mxu0 %v2953_v42  ;;  %2422 = vmatpush1.bf16.msra.mxu1 %v2957_v44 }
 0x585   :  { %2424 = vmatprep.subr.bf16.mxu0 %v2810_v55  ;;  %2456 = vmatprep.subr.bf16.mxu1 %v2814_v58 }
 0x63a   :  { %v1415_v41 = vpop.f32.mrb[10].mxu0  ;;  %v1486_v45 = vpop.f32.mrb[10].mxu1 }
 0x63b   :  { %v2513_v47 = vadd.f32 %v1486_v45, %v3009_v52  ;;  %v1417_v48 = vpop.f32.mrb[11].mxu0  ;;  %v1488_v59 = vpop.f32.mrb[11].mxu1  ;;  %v2497_v6 = vadd.f32 %v1415_v41, %v3018_v18 }
 0x63c   :  { %v2498_v60 = vadd.f32 %v1417_v48, %v3011_v54  ;;  %v2514_v3 = vadd.f32 %v1488_v59, %v3015_v11 }
 0x63d   :  { %v1929_v62 = vmul.f32 -1.442695, %v2513_v47 }
 0x63e   :  { %v1928_v63 = vmul.f32 -1.442695, %v2498_v60  ;;  %v1930_v5 = vmul.f32 -1.442695, %v2514_v3 }
 0x63f   :  { %2637 = vpow2.f32 %v1929_v62 }
 0x640   :  { %2639 = vpow2.f32 %v1928_v63 }
 0x641   :  { %2641 = vpow2.f32 %v1930_v5 }
 0x642   :  { %2643 = vtanh.f32 %v2497_v6 }
 0x649   :  { %v2638_v55 = vpop.eup %2637 }
 0x64a   :  { %v2640_v9 = vpop.eup %2639  ;;  %v1506_v58 = vadd.f32 1.0, %v2638_v55 }
 0x64b   :  { %v1505_v13 = vadd.f32 1.0, %v2640_v9  ;;  %v2642_v15 = vpop.eup %2641 }
 0x64c   :  { %2645 = vrcp.f32 %v1506_v58  ;;  %v2644_v19 = vpop.eup %2643  ;;  %v1507_v28 = vadd.f32 1.0, %v2642_v15  ;;  %v1937_v58 = vld [vmem:[%s3285_s4] ss:$0 sm:$0xff] }
 0x64d   :  { %2647 = vrcp.f32 %v1505_v13 }
 0x64e   :  { %2649 = vrcp.f32 %v1507_v28 }
 0x656   :  { %v2646_v22 = vpop.eup %2645 }
 0x657   :  { %v2648_v24 = vpop.eup %2647  ;;  %v1514_v25 = vmul.f32 %v2646_v22, %v3189_v38 }
 0x658   :  { %v1515_v29 = vmul.f32 %v2648_v24, %v2644_v19  ;;  %v2650_v34 = vpop.eup %2649  ;;  %v1938_v19 = vld [vmem:[#allocation3] ss:$0 sm:$0xff] }
 0x65a   :  { %v3231_v32 = vadd.f32 %v1515_v29, %v1514_v25 }
 0x65c   :  { %2651 = vtanh.f32 %v3231_v32 }
 0x666   :  { %v2652_v37 = vpop.eup %2651 }
 0x667   :  { %v1518_v50 = vmul.f32 %v2652_v37, %v2650_v34 }
 0x669   :  { %1588 = vmatmul.mubr.f32.vlgmr.msra.gmra.mrb[12].mxu0 %v1518_v50  ;;  %1659 = vmatmul.mubr.f32.vlgmr.msra.gmra.mrb[12].mxu1 %v1518_v50 }
 0x66a   :  { %2426 = vmatpush1.bf16.msra.mxu0 %v2821_v0  ;;  %2458 = vmatpush1.bf16.msra.mxu1 %v2826_v4 }
 0x66b   :  { %2428 = vmatprep.subr.bf16.mxu0 %v2829_v7  ;;  %2460 = vmatprep.subr.bf16.mxu1 %v2832_v10 }
 0x66c   :  { %1761 = vmatprep.mubr.f32.mxu0 %v2737_v1  ;;  %1832 = vmatprep.mubr.f32.mxu1 %v2737_v1 }
 0x66e   :  { %2430 = vmatpush1.bf16.msra.mxu0 %v2839_v14  ;;  %2462 = vmatpush1.bf16.msra.mxu1 %v2843_v17 }
 0x66f   :  { %2432 = vmatprep.subr.bf16.mxu0 %v2847_v20  ;;  %2464 = vmatprep.subr.bf16.mxu1 %v2851_v23 }
 0x672   :  { %2434 = vmatpush1.bf16.msra.mxu0 %v2858_v27  ;;  %2466 = vmatpush1.bf16.msra.mxu1 %v2862_v30 }
 0x673   :  { %2436 = vmatprep.subr.bf16.mxu0 %v2866_v33  ;;  %2468 = vmatprep.subr.bf16.mxu1 %v2870_v36 }
 0x676   :  { %2438 = vmatpush1.bf16.msra.mxu0 %v2877_v40  ;;  %2470 = vmatpush1.bf16.msra.mxu1 %v2881_v43 }
 0x677   :  { %2440 = vmatprep.subr.bf16.mxu0 %v2885_v46  ;;  %2472 = vmatprep.subr.bf16.mxu1 %v2889_v49 }
 0x67a   :  { %2442 = vmatpush1.bf16.msra.mxu0 %v2896_v53  ;;  %2474 = vmatpush1.bf16.msra.mxu1 %v2900_v57 }
 0x67b   :  { %2444 = vmatprep.subr.bf16.mxu0 %v2904_v61  ;;  %2476 = vmatprep.subr.bf16.mxu1 %v2908_v2 }
 0x67e   :  { %2446 = vmatpush1.bf16.msra.mxu0 %v2915_v8  ;;  %2478 = vmatpush1.bf16.msra.mxu1 %v2919_v12 }
 0x67f   :  { %2448 = vmatprep.subr.bf16.mxu0 %v2923_v16  ;;  %2480 = vmatprep.subr.bf16.mxu1 %v2927_v21 }
 0x682   :  { %2450 = vmatpush1.bf16.msra.mxu0 %v2934_v26  ;;  %2482 = vmatpush1.bf16.msra.mxu1 %v2938_v31 }
 0x683   :  { %2452 = vmatprep.subr.bf16.mxu0 %v2942_v35  ;;  %2484 = vmatprep.subr.bf16.mxu1 %v2946_v39 }
 0x686   :  { %2454 = vmatpush1.bf16.msra.mxu0 %v2953_v42  ;;  %2486 = vmatpush1.bf16.msra.mxu1 %v2957_v44 }
 0x73c   :  { %v1589_v1 = vpop.f32.mrb[12].mxu0  ;;  %v1660_v0 = vpop.f32.mrb[12].mxu1 }
 0x73d   :  { %v2515_v4 = vadd.f32 %v1660_v0, %v3009_v52  ;;  %v1591_v7 = vpop.f32.mrb[13].mxu0  ;;  %v1662_v10 = vpop.f32.mrb[13].mxu1  ;;  %v2499_v30 = vadd.f32 %v1589_v1, %v3018_v18 }
 0x73e   :  { %v2500_v14 = vadd.f32 %v1591_v7, %v3011_v54  ;;  %v2516_v23 = vadd.f32 %v1662_v10, %v3015_v11 }
 0x73f   :  { %v1932_v17 = vmul.f32 -1.442695, %v2515_v4 }
 0x740   :  { %v1931_v20 = vmul.f32 -1.442695, %v2500_v14  ;;  %v1933_v27 = vmul.f32 -1.442695, %v2516_v23 }
 0x741   :  { %2653 = vpow2.f32 %v1932_v17 }
 0x742   :  { %2655 = vpow2.f32 %v1931_v20 }
 0x743   :  { %2657 = vpow2.f32 %v1933_v27 }
 0x744   :  { %2659 = vtanh.f32 %v2499_v30 }
 0x74b   :  { %v2654_v33 = vpop.eup %2653 }
 0x74c   :  { %v2656_v36 = vpop.eup %2655  ;;  %v1680_v40 = vadd.f32 1.0, %v2654_v33 }
 0x74d   :  { %v1679_v43 = vadd.f32 1.0, %v2656_v36  ;;  %v2658_v46 = vpop.eup %2657 }
 0x74e   :  { %2661 = vrcp.f32 %v1680_v40  ;;  %v2660_v49 = vpop.eup %2659  ;;  %v1681_v2 = vadd.f32 1.0, %v2658_v46 }
 0x74f   :  { %2663 = vrcp.f32 %v1679_v43 }
 0x750   :  { %2665 = vrcp.f32 %v1681_v2 }
 0x758   :  { %v2662_v53 = vpop.eup %2661 }
 0x759   :  { %v2664_v57 = vpop.eup %2663  ;;  %v1688_v61 = vmul.f32 %v2662_v53, %v3231_v32 }
 0x75a   :  { %v1689_v8 = vmul.f32 %v2664_v57, %v2660_v49  ;;  %v2666_v16 = vpop.eup %2665 }
 0x75c   :  { %v1690_v12 = vadd.f32 %v1689_v8, %v1688_v61 }
 0x75e   :  { %2667 = vtanh.f32 %v1690_v12 }
 0x768   :  { %v2668_v21 = vpop.eup %2667 }
 0x769   :  { %v1692_v26 = vmul.f32 %v2668_v21, %v2666_v16 }
 0x76b   :  { %1762 = vmatmul.mubr.f32.vlgmr.msra.gmra.mrb[14].mxu0 %v1692_v26  ;;  %1833 = vmatmul.mubr.f32.vlgmr.msra.gmra.mrb[14].mxu1 %v1692_v26 }
 0x83e   :  { %v1763_v31 = vpop.f32.mrb[14].mxu0  ;;  %v1834_v35 = vpop.f32.mrb[14].mxu1 }
 0x83f   :  { %v2517_v39 = vadd.f32 %v1834_v35, %v3009_v52  ;;  %v1765_v42 = vpop.f32.mrb[15].mxu0  ;;  %v1836_v44 = vpop.f32.mrb[15].mxu1  ;;  %v2501_v47 = vadd.f32 %v1763_v31, %v3018_v18 }
 0x840   :  { %v2502_v38 = vadd.f32 %v1765_v42, %v3011_v54  ;;  %v2518_v41 = vadd.f32 %v1836_v44, %v3015_v11 }
 0x841   :  { %v1935_v51 = vmul.f32 -1.442695, %v2517_v39 }
 0x842   :  { %v1934_v56 = vmul.f32 -1.442695, %v2502_v38  ;;  %v1936_v45 = vmul.f32 -1.442695, %v2518_v41 }
 0x843   :  { %2669 = vpow2.f32 %v1935_v51 }
 0x844   :  { %2671 = vpow2.f32 %v1934_v56 }
 0x845   :  { %2673 = vpow2.f32 %v1936_v45 }
 0x846   :  { %2675 = vtanh.f32 %v2501_v47 }
 0x84d   :  { %v2670_v48 = vpop.eup %2669 }
 0x84e   :  { %v2672_v59 = vpop.eup %2671  ;;  %v1854_v60 = vadd.f32 1.0, %v2670_v48 }
 0x84f   :  { %v1853_v62 = vadd.f32 1.0, %v2672_v59  ;;  %v2674_v52 = vpop.eup %2673 }
 0x850   :  { %2677 = vrcp.f32 %v1854_v60  ;;  %v2676_v63 = vpop.eup %2675  ;;  %v1855_v5 = vadd.f32 1.0, %v2674_v52 }
 0x851   :  { %2679 = vrcp.f32 %v1853_v62 }
 0x852   :  { %2681 = vrcp.f32 %v1855_v5 }
 0x85a   :  { %v2678_v54 = vpop.eup %2677 }
 0x85b   :  { %v2680_v3 = vpop.eup %2679  ;;  %v1862_v6 = vmul.f32 %v2678_v54, %v1690_v12 }
 0x85c   :  { %v1863_v55 = vmul.f32 %v2680_v3, %v2676_v63  ;;  %v2682_v11 = vpop.eup %2681 }
 0x85e   :  { %v1864_v9 = vadd.f32 %v1863_v55, %v1862_v6 }
 0x860   :  { %2683 = vtanh.f32 %v1864_v9 }
 0x86a   :  { %v2684_v18 = vpop.eup %2683 }
 0x86b   :  { %v1866_v13 = vmul.f32 %v2684_v18, %v2682_v11 }
 0x86d   :  { %v1874_v15 = vmul.f32 %v1937_v58, %v1866_v13 }
 0x86f   :  { %1875 = vadd.xlane.f32.xlu0 %v1874_v15 }
 0x8fc   :  { %v1876_v22 = vpop.xlane.xlu0 %1875 }
 0x8fd   :  { %v1884_v24 = vadd.f32 %v1938_v19, %v1876_v22 }
 0x8ff   :  { %1886 = vst.msk [vmem:[%s3287_s6] sm:$0xff] %vm1885_vm4, %v1884_v24 }
 0x900   :  { %1891 = vsyncpa [#allocation5], 1 }
 0x901   :  { %1892 = vsyncpa [#allocation7], 1 }

</bundles_post_ra>
